<compile_context>
chip_gen: v7x
topology: tpu7x:2x2x1
jax: 0.10.0
libtpu: 0.0.40
codegen_flags: <defaults>
</compile_context>

<pallas_src>
import math
import functools

import jax
import jax.numpy as jnp
import numpy as np
from jax.experimental import pallas as pl
from jax.experimental.pallas import tpu as pltpu

NUM_HEADS = 4
EPS = 1e-5


def _instance_norm(y, axis):
    # InstanceNorm2d (biased variance, eps=1e-5, no affine): normalize each
    # channel over the spatial/sequence axis.
    mean = jnp.mean(y, axis=axis, keepdims=True)
    var = jnp.mean(jnp.square(y - mean), axis=axis, keepdims=True)
    return (y - mean) * jax.lax.rsqrt(var + EPS)


def _scale_attention_kernel(patches_ref, wc_ref, bc_ref, wi_ref, bi_ref,
                            wot_ref, bo_ref, out_ref, heads_ref, *,
                            embed_dim, num_heads, batch_block):
    # patches_ref: (bb, L, K)  im2col patches for this block of images
    # wc_ref:      (K, E)      conv weight (flattened, transposed)
    # bc_ref:      (1, E)      conv bias
    # wi_ref:      (E, 3E)     attention in_proj weight (transposed)
    # bi_ref:      (1, 3E)     attention in_proj bias
    # wot_ref:     (E, E)      attention out_proj weight (PyTorch layout, NOT transposed)
    # bo_ref:      (E, 1)      attention out_proj bias (column vector)
    # out_ref:     (bb, E, L)  channels-first output
    # heads_ref:   (L, E) f32  VMEM scratch: assembled per-head attention outputs
    E = embed_dim
    dh = E // num_heads
    sm_scale = 1.0 / math.sqrt(dh)

    # Hoist weight loads out of the per-image loop (avoid re-materializing).
    wc = wc_ref[...]
    bc = bc_ref[...]
    wi = wi_ref[...]
    bi = bi_ref[...]
    wot = wot_ref[...]
    bo = bo_ref[...]

    for b in range(batch_block):      # static unroll over images in this block
        x = patches_ref[b]            # (L, K)

        # --- strided "patchify" conv as a single matmul + bias ---
        y = jnp.dot(x, wc, preferred_element_type=jnp.float32) + bc     # (L, E)

        # --- InstanceNorm2d: per channel (column) over spatial (rows) ---
        y = _instance_norm(y, axis=0)

        # --- MultiheadAttention (self-attention, batch_first) ---
        qkv = jnp.dot(y, wi, preferred_element_type=jnp.float32) + bi   # (L, 3E)
        q = qkv[:, 0 * E:1 * E]
        k = qkv[:, 1 * E:2 * E]
        v = qkv[:, 2 * E:3 * E]

        # Per-head attention.  Head outputs are written into the (L, E) VMEM
        # scratch so the out-projection below is ONE well-shaped matmul instead
        # of 4 depth-dh MXU pushes + repeated full-width adds.
        # (The width-dh lane slices here are acceptable at E=32; for larger E
        # the q/k/v layout should be restructured head-major -- see review.)
        # TODO(synk): for large L (e.g. 256x256 inputs -> L=4096) the per-head
        # (L, L) scores would exceed v7x VMEM; add a KV grid axis with online
        # softmax (flash pattern) before scaling the spatial size.
        for h in range(num_heads):
            sl = slice(h * dh, (h + 1) * dh)
            qh = q[:, sl]
            kh = k[:, sl]
            vh = v[:, sl]
            # scores = (qh @ kh.T) / sqrt(dh)
            s = jax.lax.dot_general(qh, kh, (((1,), (1,)), ((), ())),
                                    preferred_element_type=jnp.float32) * sm_scale
            s = s - jnp.max(s, axis=-1, keepdims=True)
            p = jnp.exp(s)
            # approx=True -> EUP vrcp slot (otherwise idle); well within tolerance.
            p = p * pl.reciprocal(jnp.sum(p, axis=-1, keepdims=True), approx=True)
            heads_ref[:, sl] = jnp.dot(p, vh, preferred_element_type=jnp.float32)

        # --- out-projection, emitted directly transposed (channels-first) ---
        #   proj_T[e, l] = sum_c Wp[e, c] * heads[l, c]   ==  (heads @ Wp.T).T
        # Single a.b^T MXU matmul; fuses the output transpose into the kernel.
        proj_t = jax.lax.dot_general(wot, heads_ref[...],
                                     (((1,), (1,)), ((), ())),
                                     preferred_element_type=jnp.float32) + bo

        # --- final InstanceNorm2d in (E, L) orientation: rows = channels ---
        out_ref[b] = _instance_norm(proj_t, axis=1).astype(out_ref.dtype)


def _tensorcores_per_chip() -> int:
    """Best-effort TC-per-device count: v7x packs 2 TCs per chip, v5e/v6e have 1."""
    try:
        kind = jax.devices()[0].device_kind.lower()
    except Exception:
        return 1
    return 2 if ("v7" in kind or "7x" in kind) else 1


def _pick_batch_blocks(batch, cores):
    """Number of grid steps over the batch: one per TensorCore, dividing B."""
    n = min(batch, max(1, cores))
    while batch % n:
        n -= 1
    return n


def scale_attention_block(x, params, scale, *, batch_blocks=None):
    """Pallas forward.  x: (B, C_in, H, W) NCHW.  Returns (B, E, H/scale, W/scale)."""
    B, C_in, H, W = x.shape
    E = params["conv_w"].shape[0]
    Hs, Ws = H // scale, W // scale
    L = Hs * Ws
    K = C_in * scale * scale

    if batch_blocks is None:
        batch_blocks = _pick_batch_blocks(B, _tensorcores_per_chip())
    bb = B // batch_blocks            # images per grid step

    # im2col glue (pure data movement): (B, L, K), K ordered (c, kh, kw)
    patches = x.reshape(B, C_in, Hs, scale, Ws, scale)
    patches = patches.transpose(0, 2, 4, 1, 3, 5).reshape(B, L, K)

    # f32 throughout (v5e has no bf16 VPU; tolerance headroom kept for the
    # approx reciprocal).  bf16 MXU inputs are a possible further step on v6e/v7x.
    wc = params["conv_w"].reshape(E, K).T.astype(jnp.float32)        # (K, E)
    bc = params["conv_b"].reshape(1, E).astype(jnp.float32)
    wi = params["in_proj_w"].T.astype(jnp.float32)                   # (E, 3E)
    bi = params["in_proj_b"].reshape(1, 3 * E).astype(jnp.float32)
    wot = params["out_proj_w"].astype(jnp.float32)                   # (E, E) as-is
    bo = params["out_proj_b"].reshape(E, 1).astype(jnp.float32)      # column bias

    kernel = functools.partial(_scale_attention_kernel,
                               embed_dim=E, num_heads=NUM_HEADS, batch_block=bb)

    out_cf = pl.pallas_call(
        kernel,
        out_shape=jax.ShapeDtypeStruct((B, E, L), jnp.float32),
        grid_spec=pltpu.PrefetchScalarGridSpec(
            num_scalar_prefetch=0,
            grid=(batch_blocks,),
            in_specs=[
                pl.BlockSpec((bb, L, K), lambda i: (i, 0, 0)),
                pl.BlockSpec((K, E), lambda i: (0, 0)),
                pl.BlockSpec((1, E), lambda i: (0, 0)),
                pl.BlockSpec((E, 3 * E), lambda i: (0, 0)),
                pl.BlockSpec((1, 3 * E), lambda i: (0, 0)),
                pl.BlockSpec((E, E), lambda i: (0, 0)),
                pl.BlockSpec((E, 1), lambda i: (0, 0)),
            ],
            out_specs=pl.BlockSpec((bb, E, L), lambda i: (i, 0, 0)),
            scratch_shapes=[pltpu.VMEM((L, E), jnp.float32)],
        ),
        compiler_params=pltpu.CompilerParams(
            dimension_semantics=("parallel",)),
    )(patches.astype(jnp.float32), wc, bc, wi, bi, wot, bo)

    # Already channels-first: only split L back into the spatial grid (free reshape).
    return out_cf.reshape(B, E, Hs, Ws)


def reference_forward(x, params, scale):
    """Pure-JAX reference matching PyTorch semantics (for sanity check)."""
    B, C_in, H, W = x.shape
    E = params["conv_w"].shape[0]
    Hs, Ws = H // scale, W // scale
    L = Hs * Ws
    patches = x.reshape(B, C_in, Hs, scale, Ws, scale)
    patches = patches.transpose(0, 2, 4, 1, 3, 5).reshape(B, L, -1)

    def inorm(y):  # y: (B, L, E), normalize over L per (b, channel)
        m = y.mean(axis=1, keepdims=True)
        v = ((y - m) ** 2).mean(axis=1, keepdims=True)
        return (y - m) / jnp.sqrt(v + EPS)

    y = patches @ params["conv_w"].reshape(E, -1).T + params["conv_b"]
    y = inorm(y)

    qkv = y @ params["in_proj_w"].T + params["in_proj_b"]
    q, k, v = jnp.split(qkv, 3, axis=-1)
    dh = E // NUM_HEADS
    qh = q.reshape(B, L, NUM_HEADS, dh).transpose(0, 2, 1, 3)
    kh = k.reshape(B, L, NUM_HEADS, dh).transpose(0, 2, 1, 3)
    vh = v.reshape(B, L, NUM_HEADS, dh).transpose(0, 2, 1, 3)
    s = jnp.einsum("bhqd,bhkd->bhqk", qh, kh) / math.sqrt(dh)
    p = jax.nn.softmax(s, axis=-1)
    o = jnp.einsum("bhqk,bhkd->bhqd", p, vh).transpose(0, 2, 1, 3).reshape(B, L, E)
    o = o @ params["out_proj_w"].T + params["out_proj_b"]
    o = inorm(o)
    return o.transpose(0, 2, 1).reshape(B, E, Hs, Ws)


if __name__ == "__main__":
    # Small shapes consistent with the forward pass:
    #   in_channels=4, embed=32 (divisible by 4 heads), scale=4, side_length=16
    B, C_IN, E, SCALE, SIDE = 2, 4, 32, 4, 16

    key = jax.random.PRNGKey(0)
    ks = jax.random.split(key, 7)
    params = {
        "conv_w":     0.1 * jax.random.normal(ks[0], (E, C_IN, SCALE, SCALE), jnp.float32),
        "conv_b":     0.1 * jax.random.normal(ks[1], (E,), jnp.float32),
        "in_proj_w":  0.1 * jax.random.normal(ks[2], (3 * E, E), jnp.float32),
        "in_proj_b":  0.1 * jax.random.normal(ks[3], (3 * E,), jnp.float32),
        "out_proj_w": 0.1 * jax.random.normal(ks[4], (E, E), jnp.float32),
        "out_proj_b": 0.1 * jax.random.normal(ks[5], (E,), jnp.float32),
    }
    x = jax.random.normal(ks[6], (B, C_IN, SIDE, SIDE), jnp.float32)

    out = jax.block_until_ready(scale_attention_block(x, params, SCALE))
    ref = jax.block_until_ready(reference_forward(x, params, SCALE))

    assert out.shape == (B, E, SIDE // SCALE, SIDE // SCALE)
    np.testing.assert_allclose(np.asarray(out), np.asarray(ref), rtol=2e-2, atol=2e-2)

    print("KERNEL_OK")
</pallas_src>

<mosaic_0001>
module attributes {stable_mosaic.version = 11 : i64} {
  func.func @_scale_attention_kernel(%arg0: i32, %arg1: memref<2x16x64xf32, #tpu.memory_space<vmem>>, %arg2: memref<64x32xf32, #tpu.memory_space<vmem>>, %arg3: memref<1x32xf32, #tpu.memory_space<vmem>>, %arg4: memref<32x96xf32, #tpu.memory_space<vmem>>, %arg5: memref<1x96xf32, #tpu.memory_space<vmem>>, %arg6: memref<32x32xf32, #tpu.memory_space<vmem>>, %arg7: memref<32x1xf32, #tpu.memory_space<vmem>>, %arg8: memref<2x32x16xf32, #tpu.memory_space<vmem>>, %arg9: memref<16x32xf32, #tpu.memory_space<vmem>>) attributes {dimension_semantics = [#tpu.dimension_semantics<parallel>], iteration_bounds = array<i64: 1>, scalar_prefetch = 0 : i64, scratch_operands = 1 : i64, tpu.core_type = #tpu.core_type<tc>, window_params = [{transform_indices = @transform_0, window_bounds = array<i64: 2, 16, 64>}, {pipeline_mode = #tpu.pipeline_mode<synchronous>, transform_indices = @transform_1, window_bounds = array<i64: 64, 32>}, {pipeline_mode = #tpu.pipeline_mode<synchronous>, transform_indices = @transform_2, window_bounds = array<i64: 1, 32>}, {pipeline_mode = #tpu.pipeline_mode<synchronous>, transform_indices = @transform_3, window_bounds = array<i64: 32, 96>}, {pipeline_mode = #tpu.pipeline_mode<synchronous>, transform_indices = @transform_4, window_bounds = array<i64: 1, 96>}, {pipeline_mode = #tpu.pipeline_mode<synchronous>, transform_indices = @transform_5, window_bounds = array<i64: 32, 32>}, {pipeline_mode = #tpu.pipeline_mode<synchronous>, transform_indices = @transform_6, window_bounds = array<i64: 32, 1>}, {transform_indices = @transform_7, window_bounds = array<i64: 2, 32, 16>}]} {
    %c0 = arith.constant 0 : index
    %c0_0 = arith.constant 0 : index
    %0 = vector.load %arg2[%c0, %c0_0] : memref<64x32xf32, #tpu.memory_space<vmem>>, vector<64x32xf32>
    %c0_1 = arith.constant 0 : index
    %c0_2 = arith.constant 0 : index
    %1 = vector.load %arg3[%c0_1, %c0_2] : memref<1x32xf32, #tpu.memory_space<vmem>>, vector<1x32xf32>
    %c0_3 = arith.constant 0 : index
    %c0_4 = arith.constant 0 : index
    %2 = vector.load %arg4[%c0_3, %c0_4] : memref<32x96xf32, #tpu.memory_space<vmem>>, vector<32x96xf32>
    %c0_5 = arith.constant 0 : index
    %c0_6 = arith.constant 0 : index
    %3 = vector.load %arg5[%c0_5, %c0_6] : memref<1x96xf32, #tpu.memory_space<vmem>>, vector<1x96xf32>
    %c0_7 = arith.constant 0 : index
    %c0_8 = arith.constant 0 : index
    %4 = vector.load %arg6[%c0_7, %c0_8] : memref<32x32xf32, #tpu.memory_space<vmem>>, vector<32x32xf32>
    %c0_9 = arith.constant 0 : index
    %c0_10 = arith.constant 0 : index
    %5 = vector.load %arg7[%c0_9, %c0_10] : memref<32x1xf32, #tpu.memory_space<vmem>>, vector<32x1xf32>
    %c0_11 = arith.constant 0 : index
    %c0_12 = arith.constant 0 : index
    %c0_13 = arith.constant 0 : index
    %6 = vector.load %arg1[%c0_11, %c0_12, %c0_13] : memref<2x16x64xf32, #tpu.memory_space<vmem>>, vector<1x16x64xf32>
    %7 = vector.shape_cast %6 : vector<1x16x64xf32> to vector<16x64xf32>
    %cst = arith.constant dense<0.000000e+00> : vector<16x32xf32>
    %8 = tpu.matmul %7, %0, %cst {dimension_numbers = #tpu.dot_dimension_numbers<[1], [0], [0], [1], [0, 0, 1, 1], [], []>} : vector<16x64xf32>, vector<64x32xf32>, vector<16x32xf32> -> vector<16x32xf32>
    %9 = vector.broadcast %1 : vector<1x32xf32> to vector<16x32xf32>
    %10 = arith.addf %8, %9 : vector<16x32xf32>
    %cst_14 = arith.constant dense<0.000000e+00> : vector<32xf32>
    %11 = vector.multi_reduction <add>, %10, %cst_14 [0] : vector<16x32xf32> to vector<32xf32>
    %12 = vector.shape_cast %11 : vector<32xf32> to vector<1x32xf32>
    %cst_15 = arith.constant 1.600000e+01 : f32
    %13 = vector.broadcast %cst_15 : f32 to vector<1x32xf32>
    %14 = arith.divf %12, %13 : vector<1x32xf32>
    %15 = vector.broadcast %14 : vector<1x32xf32> to vector<16x32xf32>
    %16 = arith.subf %10, %15 : vector<16x32xf32>
    %17 = arith.mulf %16, %16 : vector<16x32xf32>
    %cst_16 = arith.constant dense<0.000000e+00> : vector<32xf32>
    %18 = vector.multi_reduction <add>, %17, %cst_16 [0] : vector<16x32xf32> to vector<32xf32>
    %19 = vector.shape_cast %18 : vector<32xf32> to vector<1x32xf32>
    %cst_17 = arith.constant 1.600000e+01 : f32
    %20 = vector.broadcast %cst_17 : f32 to vector<1x32xf32>
    %21 = arith.divf %19, %20 : vector<1x32xf32>
    %22 = vector.broadcast %14 : vector<1x32xf32> to vector<16x32xf32>
    %23 = arith.subf %10, %22 : vector<16x32xf32>
    %cst_18 = arith.constant 9.99999974E-6 : f32
    %24 = vector.broadcast %cst_18 : f32 to vector<1x32xf32>
    %25 = arith.addf %21, %24 : vector<1x32xf32>
    %26 = math.rsqrt %25 : vector<1x32xf32>
    %27 = vector.broadcast %26 : vector<1x32xf32> to vector<16x32xf32>
    %28 = arith.mulf %23, %27 : vector<16x32xf32>
    %cst_19 = arith.constant dense<0.000000e+00> : vector<16x96xf32>
    %29 = tpu.matmul %28, %2, %cst_19 {dimension_numbers = #tpu.dot_dimension_numbers<[1], [0], [0], [1], [0, 0, 1, 1], [], []>} : vector<16x32xf32>, vector<32x96xf32>, vector<16x96xf32> -> vector<16x96xf32>
    %30 = vector.broadcast %3 : vector<1x96xf32> to vector<16x96xf32>
    %31 = arith.addf %29, %30 : vector<16x96xf32>
    %32 = vector.extract_strided_slice %31 {offsets = [0, 0], sizes = [16, 32], strides = [1, 1]} : vector<16x96xf32> to vector<16x32xf32>
    %33 = vector.extract_strided_slice %31 {offsets = [0, 32], sizes = [16, 32], strides = [1, 1]} : vector<16x96xf32> to vector<16x32xf32>
    %34 = vector.extract_strided_slice %31 {offsets = [0, 64], sizes = [16, 32], strides = [1, 1]} : vector<16x96xf32> to vector<16x32xf32>
    %35 = vector.extract_strided_slice %32 {offsets = [0, 0], sizes = [16, 8], strides = [1, 1]} : vector<16x32xf32> to vector<16x8xf32>
    %36 = vector.extract_strided_slice %33 {offsets = [0, 0], sizes = [16, 8], strides = [1, 1]} : vector<16x32xf32> to vector<16x8xf32>
    %37 = vector.extract_strided_slice %34 {offsets = [0, 0], sizes = [16, 8], strides = [1, 1]} : vector<16x32xf32> to vector<16x8xf32>
    %cst_20 = arith.constant dense<0.000000e+00> : vector<16x16xf32>
    %38 = tpu.matmul %35, %36, %cst_20 {dimension_numbers = #tpu.dot_dimension_numbers<[1], [1], [0], [0], [0, 0, 1, 0], [], []>} : vector<16x8xf32>, vector<16x8xf32>, vector<16x16xf32> -> vector<16x16xf32>
    %cst_21 = arith.constant 0.353553385 : f32
    %39 = vector.broadcast %cst_21 : f32 to vector<16x16xf32>
    %40 = arith.mulf %38, %39 : vector<16x16xf32>
    %cst_22 = arith.constant dense<0xFF800000> : vector<16xf32>
    %41 = vector.multi_reduction <maximumf>, %40, %cst_22 [1] : vector<16x16xf32> to vector<16xf32>
    %42 = vector.shape_cast %41 : vector<16xf32> to vector<16x1xf32>
    %43 = vector.broadcast %42 : vector<16x1xf32> to vector<16x16xf32>
    %44 = arith.subf %40, %43 : vector<16x16xf32>
    %45 = math.exp %44 : vector<16x16xf32>
    %cst_23 = arith.constant dense<0.000000e+00> : vector<16xf32>
    %46 = vector.multi_reduction <add>, %45, %cst_23 [1] : vector<16x16xf32> to vector<16xf32>
    %47 = vector.shape_cast %46 : vector<16xf32> to vector<16x1xf32>
    %48 = tpu.reciprocal %47 {approx = true} : vector<16x1xf32> -> vector<16x1xf32>
    %49 = vector.broadcast %48 : vector<16x1xf32> to vector<16x16xf32>
    %50 = arith.mulf %45, %49 : vector<16x16xf32>
    %cst_24 = arith.constant dense<0.000000e+00> : vector<16x8xf32>
    %51 = tpu.matmul %50, %37, %cst_24 {dimension_numbers = #tpu.dot_dimension_numbers<[1], [0], [0], [1], [0, 0, 1, 1], [], []>} : vector<16x16xf32>, vector<16x8xf32>, vector<16x8xf32> -> vector<16x8xf32>
    %c0_25 = arith.constant 0 : index
    %c0_26 = arith.constant 0 : index
    %52 = vector.load %arg9[%c0_25, %c0_26] : memref<16x32xf32, #tpu.memory_space<vmem>>, vector<16x8xf32>
    tpu.vector_store %arg9[%c0_25, %c0_26], %51 {strides = array<i32>} : memref<16x32xf32, #tpu.memory_space<vmem>>, vector<16x8xf32>,
    %53 = vector.extract_strided_slice %32 {offsets = [0, 8], sizes = [16, 8], strides = [1, 1]} : vector<16x32xf32> to vector<16x8xf32>
    %54 = vector.extract_strided_slice %33 {offsets = [0, 8], sizes = [16, 8], strides = [1, 1]} : vector<16x32xf32> to vector<16x8xf32>
    %55 = vector.extract_strided_slice %34 {offsets = [0, 8], sizes = [16, 8], strides = [1, 1]} : vector<16x32xf32> to vector<16x8xf32>
    %cst_27 = arith.constant dense<0.000000e+00> : vector<16x16xf32>
    %56 = tpu.matmul %53, %54, %cst_27 {dimension_numbers = #tpu.dot_dimension_numbers<[1], [1], [0], [0], [0, 0, 1, 0], [], []>} : vector<16x8xf32>, vector<16x8xf32>, vector<16x16xf32> -> vector<16x16xf32>
    %cst_28 = arith.constant 0.353553385 : f32
    %57 = vector.broadcast %cst_28 : f32 to vector<16x16xf32>
    %58 = arith.mulf %56, %57 : vector<16x16xf32>
    %cst_29 = arith.constant dense<0xFF800000> : vector<16xf32>
    %59 = vector.multi_reduction <maximumf>, %58, %cst_29 [1] : vector<16x16xf32> to vector<16xf32>
    %60 = vector.shape_cast %59 : vector<16xf32> to vector<16x1xf32>
    %61 = vector.broadcast %60 : vector<16x1xf32> to vector<16x16xf32>
    %62 = arith.subf %58, %61 : vector<16x16xf32>
    %63 = math.exp %62 : vector<16x16xf32>
    %cst_30 = arith.constant dense<0.000000e+00> : vector<16xf32>
    %64 = vector.multi_reduction <add>, %63, %cst_30 [1] : vector<16x16xf32> to vector<16xf32>
    %65 = vector.shape_cast %64 : vector<16xf32> to vector<16x1xf32>
    %66 = tpu.reciprocal %65 {approx = true} : vector<16x1xf32> -> vector<16x1xf32>
    %67 = vector.broadcast %66 : vector<16x1xf32> to vector<16x16xf32>
    %68 = arith.mulf %63, %67 : vector<16x16xf32>
    %cst_31 = arith.constant dense<0.000000e+00> : vector<16x8xf32>
    %69 = tpu.matmul %68, %55, %cst_31 {dimension_numbers = #tpu.dot_dimension_numbers<[1], [0], [0], [1], [0, 0, 1, 1], [], []>} : vector<16x16xf32>, vector<16x8xf32>, vector<16x8xf32> -> vector<16x8xf32>
    %c0_32 = arith.constant 0 : index
    %c8 = arith.constant 8 : index
    %70 = vector.load %arg9[%c0_32, %c8] : memref<16x32xf32, #tpu.memory_space<vmem>>, vector<16x8xf32>
    tpu.vector_store %arg9[%c0_32, %c8], %69 {strides = array<i32>} : memref<16x32xf32, #tpu.memory_space<vmem>>, vector<16x8xf32>,
    %71 = vector.extract_strided_slice %32 {offsets = [0, 16], sizes = [16, 8], strides = [1, 1]} : vector<16x32xf32> to vector<16x8xf32>
    %72 = vector.extract_strided_slice %33 {offsets = [0, 16], sizes = [16, 8], strides = [1, 1]} : vector<16x32xf32> to vector<16x8xf32>
    %73 = vector.extract_strided_slice %34 {offsets = [0, 16], sizes = [16, 8], strides = [1, 1]} : vector<16x32xf32> to vector<16x8xf32>
    %cst_33 = arith.constant dense<0.000000e+00> : vector<16x16xf32>
    %74 = tpu.matmul %71, %72, %cst_33 {dimension_numbers = #tpu.dot_dimension_numbers<[1], [1], [0], [0], [0, 0, 1, 0], [], []>} : vector<16x8xf32>, vector<16x8xf32>, vector<16x16xf32> -> vector<16x16xf32>
    %cst_34 = arith.constant 0.353553385 : f32
    %75 = vector.broadcast %cst_34 : f32 to vector<16x16xf32>
    %76 = arith.mulf %74, %75 : vector<16x16xf32>
    %cst_35 = arith.constant dense<0xFF800000> : vector<16xf32>
    %77 = vector.multi_reduction <maximumf>, %76, %cst_35 [1] : vector<16x16xf32> to vector<16xf32>
    %78 = vector.shape_cast %77 : vector<16xf32> to vector<16x1xf32>
    %79 = vector.broadcast %78 : vector<16x1xf32> to vector<16x16xf32>
    %80 = arith.subf %76, %79 : vector<16x16xf32>
    %81 = math.exp %80 : vector<16x16xf32>
    %cst_36 = arith.constant dense<0.000000e+00> : vector<16xf32>
    %82 = vector.multi_reduction <add>, %81, %cst_36 [1] : vector<16x16xf32> to vector<16xf32>
    %83 = vector.shape_cast %82 : vector<16xf32> to vector<16x1xf32>
    %84 = tpu.reciprocal %83 {approx = true} : vector<16x1xf32> -> vector<16x1xf32>
    %85 = vector.broadcast %84 : vector<16x1xf32> to vector<16x16xf32>
    %86 = arith.mulf %81, %85 : vector<16x16xf32>
    %cst_37 = arith.constant dense<0.000000e+00> : vector<16x8xf32>
    %87 = tpu.matmul %86, %73, %cst_37 {dimension_numbers = #tpu.dot_dimension_numbers<[1], [0], [0], [1], [0, 0, 1, 1], [], []>} : vector<16x16xf32>, vector<16x8xf32>, vector<16x8xf32> -> vector<16x8xf32>
    %c0_38 = arith.constant 0 : index
    %c16 = arith.constant 16 : index
    %88 = vector.load %arg9[%c0_38, %c16] : memref<16x32xf32, #tpu.memory_space<vmem>>, vector<16x8xf32>
    tpu.vector_store %arg9[%c0_38, %c16], %87 {strides = array<i32>} : memref<16x32xf32, #tpu.memory_space<vmem>>, vector<16x8xf32>,
    %89 = vector.extract_strided_slice %32 {offsets = [0, 24], sizes = [16, 8], strides = [1, 1]} : vector<16x32xf32> to vector<16x8xf32>
    %90 = vector.extract_strided_slice %33 {offsets = [0, 24], sizes = [16, 8], strides = [1, 1]} : vector<16x32xf32> to vector<16x8xf32>
    %91 = vector.extract_strided_slice %34 {offsets = [0, 24], sizes = [16, 8], strides = [1, 1]} : vector<16x32xf32> to vector<16x8xf32>
    %cst_39 = arith.constant dense<0.000000e+00> : vector<16x16xf32>
    %92 = tpu.matmul %89, %90, %cst_39 {dimension_numbers = #tpu.dot_dimension_numbers<[1], [1], [0], [0], [0, 0, 1, 0], [], []>} : vector<16x8xf32>, vector<16x8xf32>, vector<16x16xf32> -> vector<16x16xf32>
    %cst_40 = arith.constant 0.353553385 : f32
    %93 = vector.broadcast %cst_40 : f32 to vector<16x16xf32>
    %94 = arith.mulf %92, %93 : vector<16x16xf32>
    %cst_41 = arith.constant dense<0xFF800000> : vector<16xf32>
    %95 = vector.multi_reduction <maximumf>, %94, %cst_41 [1] : vector<16x16xf32> to vector<16xf32>
    %96 = vector.shape_cast %95 : vector<16xf32> to vector<16x1xf32>
    %97 = vector.broadcast %96 : vector<16x1xf32> to vector<16x16xf32>
    %98 = arith.subf %94, %97 : vector<16x16xf32>
    %99 = math.exp %98 : vector<16x16xf32>
    %cst_42 = arith.constant dense<0.000000e+00> : vector<16xf32>
    %100 = vector.multi_reduction <add>, %99, %cst_42 [1] : vector<16x16xf32> to vector<16xf32>
    %101 = vector.shape_cast %100 : vector<16xf32> to vector<16x1xf32>
    %102 = tpu.reciprocal %101 {approx = true} : vector<16x1xf32> -> vector<16x1xf32>
    %103 = vector.broadcast %102 : vector<16x1xf32> to vector<16x16xf32>
    %104 = arith.mulf %99, %103 : vector<16x16xf32>
    %cst_43 = arith.constant dense<0.000000e+00> : vector<16x8xf32>
    %105 = tpu.matmul %104, %91, %cst_43 {dimension_numbers = #tpu.dot_dimension_numbers<[1], [0], [0], [1], [0, 0, 1, 1], [], []>} : vector<16x16xf32>, vector<16x8xf32>, vector<16x8xf32> -> vector<16x8xf32>
    %c0_44 = arith.constant 0 : index
    %c24 = arith.constant 24 : index
    %106 = vector.load %arg9[%c0_44, %c24] : memref<16x32xf32, #tpu.memory_space<vmem>>, vector<16x8xf32>
    tpu.vector_store %arg9[%c0_44, %c24], %105 {strides = array<i32>} : memref<16x32xf32, #tpu.memory_space<vmem>>, vector<16x8xf32>,
    %c0_45 = arith.constant 0 : index
    %c0_46 = arith.constant 0 : index
    %107 = vector.load %arg9[%c0_45, %c0_46] : memref<16x32xf32, #tpu.memory_space<vmem>>, vector<16x32xf32>
    %cst_47 = arith.constant dense<0.000000e+00> : vector<32x16xf32>
    %108 = tpu.matmul %4, %107, %cst_47 {dimension_numbers = #tpu.dot_dimension_numbers<[1], [1], [0], [0], [0, 0, 1, 0], [], []>} : vector<32x32xf32>, vector<16x32xf32>, vector<32x16xf32> -> vector<32x16xf32>
    %109 = vector.broadcast %5 : vector<32x1xf32> to vector<32x16xf32>
    %110 = arith.addf %108, %109 : vector<32x16xf32>
    %cst_48 = arith.constant dense<0.000000e+00> : vector<32xf32>
    %111 = vector.multi_reduction <add>, %110, %cst_48 [1] : vector<32x16xf32> to vector<32xf32>
    %112 = vector.shape_cast %111 : vector<32xf32> to vector<32x1xf32>
    %cst_49 = arith.constant 1.600000e+01 : f32
    %113 = vector.broadcast %cst_49 : f32 to vector<32x1xf32>
    %114 = arith.divf %112, %113 : vector<32x1xf32>
    %115 = vector.broadcast %114 : vector<32x1xf32> to vector<32x16xf32>
    %116 = arith.subf %110, %115 : vector<32x16xf32>
    %117 = arith.mulf %116, %116 : vector<32x16xf32>
    %cst_50 = arith.constant dense<0.000000e+00> : vector<32xf32>
    %118 = vector.multi_reduction <add>, %117, %cst_50 [1] : vector<32x16xf32> to vector<32xf32>
    %119 = vector.shape_cast %118 : vector<32xf32> to vector<32x1xf32>
    %cst_51 = arith.constant 1.600000e+01 : f32
    %120 = vector.broadcast %cst_51 : f32 to vector<32x1xf32>
    %121 = arith.divf %119, %120 : vector<32x1xf32>
    %122 = vector.broadcast %114 : vector<32x1xf32> to vector<32x16xf32>
    %123 = arith.subf %110, %122 : vector<32x16xf32>
    %cst_52 = arith.constant 9.99999974E-6 : f32
    %124 = vector.broadcast %cst_52 : f32 to vector<32x1xf32>
    %125 = arith.addf %121, %124 : vector<32x1xf32>
    %126 = math.rsqrt %125 : vector<32x1xf32>
    %127 = vector.broadcast %126 : vector<32x1xf32> to vector<32x16xf32>
    %128 = arith.mulf %123, %127 : vector<32x16xf32>
    %c0_53 = arith.constant 0 : index
    %c0_54 = arith.constant 0 : index
    %c0_55 = arith.constant 0 : index
    %129 = vector.load %arg8[%c0_53, %c0_54, %c0_55] : memref<2x32x16xf32, #tpu.memory_space<vmem>>, vector<1x32x16xf32>
    %130 = vector.shape_cast %129 : vector<1x32x16xf32> to vector<32x16xf32>
    %131 = vector.shape_cast %128 : vector<32x16xf32> to vector<1x32x16xf32>
    tpu.vector_store %arg8[%c0_53, %c0_54, %c0_55], %131 {strides = array<i32>} : memref<2x32x16xf32, #tpu.memory_space<vmem>>, vector<1x32x16xf32>,
    %c1 = arith.constant 1 : index
    %c0_56 = arith.constant 0 : index
    %c0_57 = arith.constant 0 : index
    %132 = vector.load %arg1[%c1, %c0_56, %c0_57] : memref<2x16x64xf32, #tpu.memory_space<vmem>>, vector<1x16x64xf32>
    %133 = vector.shape_cast %132 : vector<1x16x64xf32> to vector<16x64xf32>
    %cst_58 = arith.constant dense<0.000000e+00> : vector<16x32xf32>
    %134 = tpu.matmul %133, %0, %cst_58 {dimension_numbers = #tpu.dot_dimension_numbers<[1], [0], [0], [1], [0, 0, 1, 1], [], []>} : vector<16x64xf32>, vector<64x32xf32>, vector<16x32xf32> -> vector<16x32xf32>
    %135 = vector.broadcast %1 : vector<1x32xf32> to vector<16x32xf32>
    %136 = arith.addf %134, %135 : vector<16x32xf32>
    %cst_59 = arith.constant dense<0.000000e+00> : vector<32xf32>
    %137 = vector.multi_reduction <add>, %136, %cst_59 [0] : vector<16x32xf32> to vector<32xf32>
    %138 = vector.shape_cast %137 : vector<32xf32> to vector<1x32xf32>
    %cst_60 = arith.constant 1.600000e+01 : f32
    %139 = vector.broadcast %cst_60 : f32 to vector<1x32xf32>
    %140 = arith.divf %138, %139 : vector<1x32xf32>
    %141 = vector.broadcast %140 : vector<1x32xf32> to vector<16x32xf32>
    %142 = arith.subf %136, %141 : vector<16x32xf32>
    %143 = arith.mulf %142, %142 : vector<16x32xf32>
    %cst_61 = arith.constant dense<0.000000e+00> : vector<32xf32>
    %144 = vector.multi_reduction <add>, %143, %cst_61 [0] : vector<16x32xf32> to vector<32xf32>
    %145 = vector.shape_cast %144 : vector<32xf32> to vector<1x32xf32>
    %cst_62 = arith.constant 1.600000e+01 : f32
    %146 = vector.broadcast %cst_62 : f32 to vector<1x32xf32>
    %147 = arith.divf %145, %146 : vector<1x32xf32>
    %148 = vector.broadcast %140 : vector<1x32xf32> to vector<16x32xf32>
    %149 = arith.subf %136, %148 : vector<16x32xf32>
    %cst_63 = arith.constant 9.99999974E-6 : f32
    %150 = vector.broadcast %cst_63 : f32 to vector<1x32xf32>
    %151 = arith.addf %147, %150 : vector<1x32xf32>
    %152 = math.rsqrt %151 : vector<1x32xf32>
    %153 = vector.broadcast %152 : vector<1x32xf32> to vector<16x32xf32>
    %154 = arith.mulf %149, %153 : vector<16x32xf32>
    %cst_64 = arith.constant dense<0.000000e+00> : vector<16x96xf32>
    %155 = tpu.matmul %154, %2, %cst_64 {dimension_numbers = #tpu.dot_dimension_numbers<[1], [0], [0], [1], [0, 0, 1, 1], [], []>} : vector<16x32xf32>, vector<32x96xf32>, vector<16x96xf32> -> vector<16x96xf32>
    %156 = vector.broadcast %3 : vector<1x96xf32> to vector<16x96xf32>
    %157 = arith.addf %155, %156 : vector<16x96xf32>
    %158 = vector.extract_strided_slice %157 {offsets = [0, 0], sizes = [16, 32], strides = [1, 1]} : vector<16x96xf32> to vector<16x32xf32>
    %159 = vector.extract_strided_slice %157 {offsets = [0, 32], sizes = [16, 32], strides = [1, 1]} : vector<16x96xf32> to vector<16x32xf32>
    %160 = vector.extract_strided_slice %157 {offsets = [0, 64], sizes = [16, 32], strides = [1, 1]} : vector<16x96xf32> to vector<16x32xf32>
    %161 = vector.extract_strided_slice %158 {offsets = [0, 0], sizes = [16, 8], strides = [1, 1]} : vector<16x32xf32> to vector<16x8xf32>
    %162 = vector.extract_strided_slice %159 {offsets = [0, 0], sizes = [16, 8], strides = [1, 1]} : vector<16x32xf32> to vector<16x8xf32>
    %163 = vector.extract_strided_slice %160 {offsets = [0, 0], sizes = [16, 8], strides = [1, 1]} : vector<16x32xf32> to vector<16x8xf32>
    %cst_65 = arith.constant dense<0.000000e+00> : vector<16x16xf32>
    %164 = tpu.matmul %161, %162, %cst_65 {dimension_numbers = #tpu.dot_dimension_numbers<[1], [1], [0], [0], [0, 0, 1, 0], [], []>} : vector<16x8xf32>, vector<16x8xf32>, vector<16x16xf32> -> vector<16x16xf32>
    %cst_66 = arith.constant 0.353553385 : f32
    %165 = vector.broadcast %cst_66 : f32 to vector<16x16xf32>
    %166 = arith.mulf %164, %165 : vector<16x16xf32>
    %cst_67 = arith.constant dense<0xFF800000> : vector<16xf32>
    %167 = vector.multi_reduction <maximumf>, %166, %cst_67 [1] : vector<16x16xf32> to vector<16xf32>
    %168 = vector.shape_cast %167 : vector<16xf32> to vector<16x1xf32>
    %169 = vector.broadcast %168 : vector<16x1xf32> to vector<16x16xf32>
    %170 = arith.subf %166, %169 : vector<16x16xf32>
    %171 = math.exp %170 : vector<16x16xf32>
    %cst_68 = arith.constant dense<0.000000e+00> : vector<16xf32>
    %172 = vector.multi_reduction <add>, %171, %cst_68 [1] : vector<16x16xf32> to vector<16xf32>
    %173 = vector.shape_cast %172 : vector<16xf32> to vector<16x1xf32>
    %174 = tpu.reciprocal %173 {approx = true} : vector<16x1xf32> -> vector<16x1xf32>
    %175 = vector.broadcast %174 : vector<16x1xf32> to vector<16x16xf32>
    %176 = arith.mulf %171, %175 : vector<16x16xf32>
    %cst_69 = arith.constant dense<0.000000e+00> : vector<16x8xf32>
    %177 = tpu.matmul %176, %163, %cst_69 {dimension_numbers = #tpu.dot_dimension_numbers<[1], [0], [0], [1], [0, 0, 1, 1], [], []>} : vector<16x16xf32>, vector<16x8xf32>, vector<16x8xf32> -> vector<16x8xf32>
    %c0_70 = arith.constant 0 : index
    %c0_71 = arith.constant 0 : index
    %178 = vector.load %arg9[%c0_70, %c0_71] : memref<16x32xf32, #tpu.memory_space<vmem>>, vector<16x8xf32>
    tpu.vector_store %arg9[%c0_70, %c0_71], %177 {strides = array<i32>} : memref<16x32xf32, #tpu.memory_space<vmem>>, vector<16x8xf32>,
    %179 = vector.extract_strided_slice %158 {offsets = [0, 8], sizes = [16, 8], strides = [1, 1]} : vector<16x32xf32> to vector<16x8xf32>
    %180 = vector.extract_strided_slice %159 {offsets = [0, 8], sizes = [16, 8], strides = [1, 1]} : vector<16x32xf32> to vector<16x8xf32>
    %181 = vector.extract_strided_slice %160 {offsets = [0, 8], sizes = [16, 8], strides = [1, 1]} : vector<16x32xf32> to vector<16x8xf32>
    %cst_72 = arith.constant dense<0.000000e+00> : vector<16x16xf32>
    %182 = tpu.matmul %179, %180, %cst_72 {dimension_numbers = #tpu.dot_dimension_numbers<[1], [1], [0], [0], [0, 0, 1, 0], [], []>} : vector<16x8xf32>, vector<16x8xf32>, vector<16x16xf32> -> vector<16x16xf32>
    %cst_73 = arith.constant 0.353553385 : f32
    %183 = vector.broadcast %cst_73 : f32 to vector<16x16xf32>
    %184 = arith.mulf %182, %183 : vector<16x16xf32>
    %cst_74 = arith.constant dense<0xFF800000> : vector<16xf32>
    %185 = vector.multi_reduction <maximumf>, %184, %cst_74 [1] : vector<16x16xf32> to vector<16xf32>
    %186 = vector.shape_cast %185 : vector<16xf32> to vector<16x1xf32>
    %187 = vector.broadcast %186 : vector<16x1xf32> to vector<16x16xf32>
    %188 = arith.subf %184, %187 : vector<16x16xf32>
    %189 = math.exp %188 : vector<16x16xf32>
    %cst_75 = arith.constant dense<0.000000e+00> : vector<16xf32>
    %190 = vector.multi_reduction <add>, %189, %cst_75 [1] : vector<16x16xf32> to vector<16xf32>
    %191 = vector.shape_cast %190 : vector<16xf32> to vector<16x1xf32>
    %192 = tpu.reciprocal %191 {approx = true} : vector<16x1xf32> -> vector<16x1xf32>
    %193 = vector.broadcast %192 : vector<16x1xf32> to vector<16x16xf32>
    %194 = arith.mulf %189, %193 : vector<16x16xf32>
    %cst_76 = arith.constant dense<0.000000e+00> : vector<16x8xf32>
    %195 = tpu.matmul %194, %181, %cst_76 {dimension_numbers = #tpu.dot_dimension_numbers<[1], [0], [0], [1], [0, 0, 1, 1], [], []>} : vector<16x16xf32>, vector<16x8xf32>, vector<16x8xf32> -> vector<16x8xf32>
    %c0_77 = arith.constant 0 : index
    %c8_78 = arith.constant 8 : index
    %196 = vector.load %arg9[%c0_77, %c8_78] : memref<16x32xf32, #tpu.memory_space<vmem>>, vector<16x8xf32>
    tpu.vector_store %arg9[%c0_77, %c8_78], %195 {strides = array<i32>} : memref<16x32xf32, #tpu.memory_space<vmem>>, vector<16x8xf32>,
    %197 = vector.extract_strided_slice %158 {offsets = [0, 16], sizes = [16, 8], strides = [1, 1]} : vector<16x32xf32> to vector<16x8xf32>
    %198 = vector.extract_strided_slice %159 {offsets = [0, 16], sizes = [16, 8], strides = [1, 1]} : vector<16x32xf32> to vector<16x8xf32>
    %199 = vector.extract_strided_slice %160 {offsets = [0, 16], sizes = [16, 8], strides = [1, 1]} : vector<16x32xf32> to vector<16x8xf32>
    %cst_79 = arith.constant dense<0.000000e+00> : vector<16x16xf32>
    %200 = tpu.matmul %197, %198, %cst_79 {dimension_numbers = #tpu.dot_dimension_numbers<[1], [1], [0], [0], [0, 0, 1, 0], [], []>} : vector<16x8xf32>, vector<16x8xf32>, vector<16x16xf32> -> vector<16x16xf32>
    %cst_80 = arith.constant 0.353553385 : f32
    %201 = vector.broadcast %cst_80 : f32 to vector<16x16xf32>
    %202 = arith.mulf %200, %201 : vector<16x16xf32>
    %cst_81 = arith.constant dense<0xFF800000> : vector<16xf32>
    %203 = vector.multi_reduction <maximumf>, %202, %cst_81 [1] : vector<16x16xf32> to vector<16xf32>
    %204 = vector.shape_cast %203 : vector<16xf32> to vector<16x1xf32>
    %205 = vector.broadcast %204 : vector<16x1xf32> to vector<16x16xf32>
    %206 = arith.subf %202, %205 : vector<16x16xf32>
    %207 = math.exp %206 : vector<16x16xf32>
    %cst_82 = arith.constant dense<0.000000e+00> : vector<16xf32>
    %208 = vector.multi_reduction <add>, %207, %cst_82 [1] : vector<16x16xf32> to vector<16xf32>
    %209 = vector.shape_cast %208 : vector<16xf32> to vector<16x1xf32>
    %210 = tpu.reciprocal %209 {approx = true} : vector<16x1xf32> -> vector<16x1xf32>
    %211 = vector.broadcast %210 : vector<16x1xf32> to vector<16x16xf32>
    %212 = arith.mulf %207, %211 : vector<16x16xf32>
    %cst_83 = arith.constant dense<0.000000e+00> : vector<16x8xf32>
    %213 = tpu.matmul %212, %199, %cst_83 {dimension_numbers = #tpu.dot_dimension_numbers<[1], [0], [0], [1], [0, 0, 1, 1], [], []>} : vector<16x16xf32>, vector<16x8xf32>, vector<16x8xf32> -> vector<16x8xf32>
    %c0_84 = arith.constant 0 : index
    %c16_85 = arith.constant 16 : index
    %214 = vector.load %arg9[%c0_84, %c16_85] : memref<16x32xf32, #tpu.memory_space<vmem>>, vector<16x8xf32>
    tpu.vector_store %arg9[%c0_84, %c16_85], %213 {strides = array<i32>} : memref<16x32xf32, #tpu.memory_space<vmem>>, vector<16x8xf32>,
    %215 = vector.extract_strided_slice %158 {offsets = [0, 24], sizes = [16, 8], strides = [1, 1]} : vector<16x32xf32> to vector<16x8xf32>
    %216 = vector.extract_strided_slice %159 {offsets = [0, 24], sizes = [16, 8], strides = [1, 1]} : vector<16x32xf32> to vector<16x8xf32>
    %217 = vector.extract_strided_slice %160 {offsets = [0, 24], sizes = [16, 8], strides = [1, 1]} : vector<16x32xf32> to vector<16x8xf32>
    %cst_86 = arith.constant dense<0.000000e+00> : vector<16x16xf32>
    %218 = tpu.matmul %215, %216, %cst_86 {dimension_numbers = #tpu.dot_dimension_numbers<[1], [1], [0], [0], [0, 0, 1, 0], [], []>} : vector<16x8xf32>, vector<16x8xf32>, vector<16x16xf32> -> vector<16x16xf32>
    %cst_87 = arith.constant 0.353553385 : f32
    %219 = vector.broadcast %cst_87 : f32 to vector<16x16xf32>
    %220 = arith.mulf %218, %219 : vector<16x16xf32>
    %cst_88 = arith.constant dense<0xFF800000> : vector<16xf32>
    %221 = vector.multi_reduction <maximumf>, %220, %cst_88 [1] : vector<16x16xf32> to vector<16xf32>
    %222 = vector.shape_cast %221 : vector<16xf32> to vector<16x1xf32>
    %223 = vector.broadcast %222 : vector<16x1xf32> to vector<16x16xf32>
    %224 = arith.subf %220, %223 : vector<16x16xf32>
    %225 = math.exp %224 : vector<16x16xf32>
    %cst_89 = arith.constant dense<0.000000e+00> : vector<16xf32>
    %226 = vector.multi_reduction <add>, %225, %cst_89 [1] : vector<16x16xf32> to vector<16xf32>
    %227 = vector.shape_cast %226 : vector<16xf32> to vector<16x1xf32>
    %228 = tpu.reciprocal %227 {approx = true} : vector<16x1xf32> -> vector<16x1xf32>
    %229 = vector.broadcast %228 : vector<16x1xf32> to vector<16x16xf32>
    %230 = arith.mulf %225, %229 : vector<16x16xf32>
    %cst_90 = arith.constant dense<0.000000e+00> : vector<16x8xf32>
    %231 = tpu.matmul %230, %217, %cst_90 {dimension_numbers = #tpu.dot_dimension_numbers<[1], [0], [0], [1], [0, 0, 1, 1], [], []>} : vector<16x16xf32>, vector<16x8xf32>, vector<16x8xf32> -> vector<16x8xf32>
    %c0_91 = arith.constant 0 : index
    %c24_92 = arith.constant 24 : index
    %232 = vector.load %arg9[%c0_91, %c24_92] : memref<16x32xf32, #tpu.memory_space<vmem>>, vector<16x8xf32>
    tpu.vector_store %arg9[%c0_91, %c24_92], %231 {strides = array<i32>} : memref<16x32xf32, #tpu.memory_space<vmem>>, vector<16x8xf32>,
    %c0_93 = arith.constant 0 : index
    %c0_94 = arith.constant 0 : index
    %233 = vector.load %arg9[%c0_93, %c0_94] : memref<16x32xf32, #tpu.memory_space<vmem>>, vector<16x32xf32>
    %cst_95 = arith.constant dense<0.000000e+00> : vector<32x16xf32>
    %234 = tpu.matmul %4, %233, %cst_95 {dimension_numbers = #tpu.dot_dimension_numbers<[1], [1], [0], [0], [0, 0, 1, 0], [], []>} : vector<32x32xf32>, vector<16x32xf32>, vector<32x16xf32> -> vector<32x16xf32>
    %235 = vector.broadcast %5 : vector<32x1xf32> to vector<32x16xf32>
    %236 = arith.addf %234, %235 : vector<32x16xf32>
    %cst_96 = arith.constant dense<0.000000e+00> : vector<32xf32>
    %237 = vector.multi_reduction <add>, %236, %cst_96 [1] : vector<32x16xf32> to vector<32xf32>
    %238 = vector.shape_cast %237 : vector<32xf32> to vector<32x1xf32>
    %cst_97 = arith.constant 1.600000e+01 : f32
    %239 = vector.broadcast %cst_97 : f32 to vector<32x1xf32>
    %240 = arith.divf %238, %239 : vector<32x1xf32>
    %241 = vector.broadcast %240 : vector<32x1xf32> to vector<32x16xf32>
    %242 = arith.subf %236, %241 : vector<32x16xf32>
    %243 = arith.mulf %242, %242 : vector<32x16xf32>
    %cst_98 = arith.constant dense<0.000000e+00> : vector<32xf32>
    %244 = vector.multi_reduction <add>, %243, %cst_98 [1] : vector<32x16xf32> to vector<32xf32>
    %245 = vector.shape_cast %244 : vector<32xf32> to vector<32x1xf32>
    %cst_99 = arith.constant 1.600000e+01 : f32
    %246 = vector.broadcast %cst_99 : f32 to vector<32x1xf32>
    %247 = arith.divf %245, %246 : vector<32x1xf32>
    %248 = vector.broadcast %240 : vector<32x1xf32> to vector<32x16xf32>
    %249 = arith.subf %236, %248 : vector<32x16xf32>
    %cst_100 = arith.constant 9.99999974E-6 : f32
    %250 = vector.broadcast %cst_100 : f32 to vector<32x1xf32>
    %251 = arith.addf %247, %250 : vector<32x1xf32>
    %252 = math.rsqrt %251 : vector<32x1xf32>
    %253 = vector.broadcast %252 : vector<32x1xf32> to vector<32x16xf32>
    %254 = arith.mulf %249, %253 : vector<32x16xf32>
    %c1_101 = arith.constant 1 : index
    %c0_102 = arith.constant 0 : index
    %c0_103 = arith.constant 0 : index
    %255 = vector.load %arg8[%c1_101, %c0_102, %c0_103] : memref<2x32x16xf32, #tpu.memory_space<vmem>>, vector<1x32x16xf32>
    %256 = vector.shape_cast %255 : vector<1x32x16xf32> to vector<32x16xf32>
    %257 = vector.shape_cast %254 : vector<32x16xf32> to vector<1x32x16xf32>
    tpu.vector_store %arg8[%c1_101, %c0_102, %c0_103], %257 {strides = array<i32>} : memref<2x32x16xf32, #tpu.memory_space<vmem>>, vector<1x32x16xf32>,
    return
  }
  func.func @transform_0(%arg0: i32) -> (i32, i32, i32) {
    %c0_i32 = arith.constant 0 : i32
    %c0_i32_0 = arith.constant 0 : i32
    %c0_i32_1 = arith.constant 0 : i32
    return %arg0, %c0_i32, %c0_i32_0 : i32, i32, i32
  }
  func.func @transform_1(%arg0: i32) -> (i32, i32) {
    %c0_i32 = arith.constant 0 : i32
    %c0_i32_0 = arith.constant 0 : i32
    %c0_i32_1 = arith.constant 0 : i32
    return %c0_i32, %c0_i32_0 : i32, i32
  }
  func.func @transform_2(%arg0: i32) -> (i32, i32) {
    %c0_i32 = arith.constant 0 : i32
    %c0_i32_0 = arith.constant 0 : i32
    %c0_i32_1 = arith.constant 0 : i32
    return %c0_i32, %c0_i32_0 : i32, i32
  }
  func.func @transform_3(%arg0: i32) -> (i32, i32) {
    %c0_i32 = arith.constant 0 : i32
    %c0_i32_0 = arith.constant 0 : i32
    %c0_i32_1 = arith.constant 0 : i32
    return %c0_i32, %c0_i32_0 : i32, i32
  }
  func.func @transform_4(%arg0: i32) -> (i32, i32) {
    %c0_i32 = arith.constant 0 : i32
    %c0_i32_0 = arith.constant 0 : i32
    %c0_i32_1 = arith.constant 0 : i32
    return %c0_i32, %c0_i32_0 : i32, i32
  }
  func.func @transform_5(%arg0: i32) -> (i32, i32) {
    %c0_i32 = arith.constant 0 : i32
    %c0_i32_0 = arith.constant 0 : i32
    %c0_i32_1 = arith.constant 0 : i32
    return %c0_i32, %c0_i32_0 : i32, i32
  }
  func.func @transform_6(%arg0: i32) -> (i32, i32) {
    %c0_i32 = arith.constant 0 : i32
    %c0_i32_0 = arith.constant 0 : i32
    %c0_i32_1 = arith.constant 0 : i32
    return %c0_i32, %c0_i32_0 : i32, i32
  }
  func.func @transform_7(%arg0: i32) -> (i32, i32, i32) {
    %c0_i32 = arith.constant 0 : i32
    %c0_i32_0 = arith.constant 0 : i32
    %c0_i32_1 = arith.constant 0 : i32
    return %arg0, %c0_i32, %c0_i32_0 : i32, i32, i32
  }
}

</mosaic_0001>

<bundles_post_ra>
// kernel: tpu_custom_call.1
= control target key start
LH: loop header
LB: loop body
LE: loop exit
PB: predicated region body
PF: predicated region fallthrough
CT: control target
= control target key end

     0   :  { %vm56_vm0 = vcmask 523264   ;;  %vm138_vm1 = vcmask 261120   ;;  %vm261_vm2 = vcmask 64512   ;;  %s3161_s30 = smov 96   ;;  %vm347_vm4 = vcmask 130048   ;;  %s3163_s8 = smov 88   ;;  %s3714_s1 = inlined_call_operand.vmem [shape: f32[64,32], index: 1, kind: input, shape index: {}]   ;;  %s3715_s0 = inlined_call_operand.vmem [shape: f32[2,16,64], index: 0, kind: input, shape index: {}]   ;;  %s3716_s3 = inlined_call_operand.vmem [shape: f32[32,96], index: 3, kind: input, shape index: {}]   ;;  %s3717_s2 = inlined_call_operand.vmem [shape: f32[1,32], index: 2, kind: input, shape index: {}]   ;;  %s3718_s4 = inlined_call_operand.vmem [shape: f32[1,96], index: 4, kind: input, shape index: {}]   ;;  %s3719_s5 = inlined_call_operand.vmem [shape: f32[32,32], index: 5, kind: input, shape index: {}]   ;;  %s3720_s6 = inlined_call_operand.vmem [shape: f32[32,1], index: 6, kind: input, shape index: {}]   ;;  %s3721_s7 = inlined_call_operand.vmem [shape: f32[2,32,16], index: 7, kind: output, shape index: {}]  }
   0x1   :  { %v26_v0 = vld [vmem:[%s3714_s1] sm:$0xff]  ;;  %v27_v1 = vld [vmem:[%s3714_s1 + $0x8] sm:$0xff]  ;;  %v28_v2 = vld [vmem:[%s3714_s1 + $0x10] sm:$0xff]  ;;  %s3164_s9 = smov 120   ;;  %s3165_s10 = smov 56   ;;  %vm669_vm5 = vcmask 130112  }
   0x2   :  { %v3225_v3 = vpack.c.bf16 %v27_v1, %v26_v0  ;;  %v29_v4 = vld [vmem:[%s3714_s1 + $0x18] sm:$0xff]  ;;  %v30_v6 = vld [vmem:[%s3714_s1 + $0x20] sm:$0xff]  ;;  %v31_v7 = vld [vmem:[%s3714_s1 + $0x28] sm:$0xff]  ;;  %s3166_s11 = smov 80   ;;  %s3167_s12 = smov 112   ;;  %vm882_vm6 = vcmask 195712  }
   0x3   :  { %v3230_v5 = vpack.c.bf16 %v29_v4, %v28_v2  ;;  %v48_v8 = vld [vmem:[%s3715_s0] sm:$0xff]  ;;  %v3245_v9 = vpack.c.bf16 %v31_v7, %v30_v6  ;;  %v32_v10 = vld [vmem:[%s3714_s1 + $0x30] sm:$0xff]  ;;  %v33_v11 = vld [vmem:[%s3714_s1 + $0x38] sm:$0xff]  ;;  %s3168_s13 = smov 72   ;;  %s3169_s14 = smov 104   ;;  %vm1095_vm7 = vcmask 261312  }
   0x4   :  { %2841 = vmatprep.subr.bf16.mxu0 %v3225_v3  ;;  %2664 = vmatprep.mubr.msk.f32.mxu0 %vm56_vm0, %v48_v8  ;;  %v3255_v12 = vpack.c.bf16 %v33_v11, %v32_v10  ;;  %v49_v13 = vld [vmem:[%s3715_s0 + $0x8] sm:$0xff]  ;;  %v35_v14 = vld [vmem:[%s3716_s3] sm:$0xff]  ;;  %v37_v16 = vld [vmem:[%s3716_s3 + $0x10] sm:$0xff]  ;;  %s3170_s15 = smov 48   ;;  %s3171_s16 = smov 8  }
   0x5   :  { %2843 = vmatpush3.bf16.msra.mxu0 %v3225_v3  ;;  %v36_v15 = vld [vmem:[%s3716_s3 + $0x8] sm:$0xff]  ;;  %v38_v18 = vld [vmem:[%s3716_s3 + $0x18] sm:$0xff]  ;;  %v3287_v20 = vld [vmem:[%s3717_s2] ss:$0 sm:$0xff]  ;;  %s3172_s17 = smov 40   ;;  %s3173_s18 = smov 16  }
   0x6   :  { %2845 = vmatprep.subr.bf16.mxu0 %v3230_v5  ;;  %v3273_v17 = vpack.c.bf16 %v36_v15, %v35_v14  ;;  %v3278_v19 = vpack.c.bf16 %v38_v18, %v37_v16  ;;  %v3300_v53 = vld [vmem:[%s3718_s4] ss:$0 sm:$0xff]  ;;  %vm3318_vm3 = vmpackc.low %vm261_vm2, %vm261_vm2  ;;  %s3162_s4 = smov 64  }
   0x7   :  { %vm3447_vm8 = vmpackc.low %vm138_vm1, %vm138_vm1 }
   0x8   :  { %2857 = vmatprep.subr.bf16.mxu1 %v3273_v17 }
   0x9   :  { %2847 = vmatpush3.bf16.msra.mxu0 %v3230_v5  ;;  %2859 = vmatpush3.bf16.msra.mxu1 %v3273_v17 }
   0xa   :  { %2849 = vmatprep.subr.bf16.mxu0 %v3245_v9  ;;  %2861 = vmatprep.subr.bf16.mxu1 %v3278_v19 }
   0xd   :  { %2851 = vmatpush3.bf16.msra.mxu0 %v3245_v9  ;;  %2863 = vmatpush3.bf16.msra.mxu1 %v3278_v19 }
   0xe   :  { %2853 = vmatprep.subr.bf16.mxu0 %v3255_v12 }
  0x11   :  { %2855 = vmatpush3.bf16.msra.mxu0 %v3255_v12 }
  0x14   :  { %2665 = vmatmul.mubr.msk.f32.vlgmr.msra.gmra.mrb[0].mxu0 %vm56_vm0, %v49_v13 }
  0xe7   :  { %v2666_v21 = vpop.f32.mrb[0].mxu0 }
  0xe8   :  { %v135_v22 = vadd.f32 %v2666_v21, %v3287_v20  ;;  %v129_v23 = vpop.f32.mrb[1].mxu0 }
  0xe9   :  { %v130_v24 = vadd.f32 %v3287_v20, %v129_v23 }
  0xea   :  { %v140_v25 = vsel %vm138_vm1, %v135_v22, 0.0 }
  0xeb   :  { %v139_v26 = vsel %vm138_vm1, %v130_v24, 0.0 }
  0xec   :  { %v141_v27 = vadd.f32 %v140_v25, %v139_v26 }
  0xee   :  { %v142_v28 = vrot.slane %v141_v27, 4 }
  0xf0   :  { %v143_v29 = vadd.f32 %v142_v28, %v141_v27 }
  0xf2   :  { %v144_v30 = vrot.slane %v143_v29, 2 }
  0xf4   :  { %v145_v31 = vadd.f32 %v144_v30, %v143_v29 }
  0xf6   :  { %v146_v32 = vrot.slane %v145_v31, 1 }
  0xf8   :  { %v147_v33 = vadd.f32 %v146_v32, %v145_v31 }
  0xfa   :  { %v149_v34 = vmul.f32 0.0625, %v147_v33 }
  0xfc   :  { %v150_v35 = vsub.f32 %v130_v24, %v149_v34  ;;  %v151_v36 = vsub.f32 %v135_v22, %v149_v34 }
  0xfe   :  { %v152_v37 = vmul.f32 %v150_v35, %v150_v35  ;;  %v153_v38 = vmul.f32 %v151_v36, %v151_v36 }
 0x100   :  { %v154_v39 = vsel %vm138_vm1, %v152_v37, 0.0  ;;  %v155_v40 = vsel %vm138_vm1, %v153_v38, 0.0 }
 0x101   :  { %v156_v41 = vadd.f32 %v155_v40, %v154_v39 }
 0x103   :  { %v157_v42 = vrot.slane %v156_v41, 4 }
 0x105   :  { %v158_v43 = vadd.f32 %v157_v42, %v156_v41 }
 0x107   :  { %v159_v44 = vrot.slane %v158_v43, 2 }
 0x109   :  { %v160_v45 = vadd.f32 %v159_v44, %v158_v43 }
 0x10b   :  { %v161_v46 = vrot.slane %v160_v45, 1 }
 0x10d   :  { %v162_v47 = vadd.f32 %v161_v46, %v160_v45 }
 0x10f   :  { %v163_v48 = vmul.f32 0.0625, %v162_v47 }
 0x111   :  { %v164_v49 = vadd.f32 1e-05, %v163_v48 }
 0x113   :  { %3077 = vrsqrt.f32 %v164_v49 }
 0x11d   :  { %v3078_v50 = vpop.eup %3077 }
 0x11e   :  { %v166_v51 = vmul.f32 %v3078_v50, %v150_v35  ;;  %v167_v52 = vmul.f32 %v3078_v50, %v151_v36 }
 0x120   :  { %2675 = vmatprep.mubr.msk.f32.mxu1 %vm138_vm1, %v166_v51 }
 0x121   :  { %2676 = vmatmul.mubr.msk.f32.vlgmr.msra.gmra.mrb[0].mxu1 %vm138_vm1, %v167_v52 }
 0x1f4   :  { %v2677_v54 = vpop.f32.mrb[0].mxu1 }
 0x1f5   :  { %v3303_v55 = vadd.f32 %v2677_v54, %v3300_v53  ;;  %v246_v56 = vpop.f32.mrb[1].mxu1 }
 0x1f6   :  { %v3306_v57 = vadd.f32 %v3300_v53, %v246_v56 }
 0x1f8   :  { %2682 = vmatprep.mubr.msk.f32.mxu1 %vm261_vm2, %v3306_v57  ;;  %v3312_v58 = vpack.i.bf16 %v3303_v55, %v3306_v57 }
 0x1fa   :  { %2996 = vrot.lane.b32.xlu0 %v3312_v58, %s3161_s30 }
 0x26c   :  { %v2997_v59 = vpop.permute.xlu0 %2996 }
 0x26d   :  { %v2999_v60 = vunpack.i.h.bf16 %v2997_v59  ;;  %v2998_v61 = vunpack.i.l.bf16 %v2997_v59 }
 0x26f   :  { %v2864_v63 = vpack.c.bf16 %v2999_v60, %v2998_v61 }
 0x271   :  { %2866 = vmatprep.subr.msk.bf16.mxu1 %vm3318_vm3, %v2864_v63 }
 0x272   :  { %2869 = vmatpush3.bf16.xpose.msk.msra.mxu1 %vm3318_vm3, %v2864_v63 }
 0x279   :  { %2683 = vmatmul.mubr.msk.f32.vlgmr.msra.gmra.mrb[2].mxu1 %vm261_vm2, %v3303_v55 }
 0x34c   :  { %v2684_v0 = vpop.f32.mrb[2].mxu1 }
 0x34d   :  { %v346_v1 = vmul.f32 0.35355338, %v2684_v0  ;;  %v336_v2 = vpop.f32.mrb[3].mxu1 }
 0x34e   :  { %v345_v4 = vmul.f32 0.35355338, %v336_v2 }
 0x34f   :  { %v351_v6 = vsel %vm347_vm4, %v346_v1, -inf }
 0x350   :  { %352 = vmax.xlane.f32.xlu1 %v351_v6  ;;  %v348_v7 = vsel %vm347_vm4, %v345_v4, -inf }
 0x351   :  { %349 = vmax.xlane.f32.xlu0 %v348_v7 }
 0x361   :  { %3001 = vrot.lane.b32.xlu1 %v3312_v58, %s3162_s4 }
 0x365   :  { %3006 = vrot.lane.b32.xlu1 %v3312_v58, %s3163_s8 }
 0x367   :  { %461 = vrot.lane.b32.xlu0 %v3303_v55, %s3164_s9 }
 0x3dd   :  { %v353_v8 = vpop.xlane.xlu1 %352 }
 0x3de   :  { %v355_v10 = vsub.f32 %v346_v1, %v353_v8  ;;  %v350_v11 = vpop.xlane.xlu0 %349 }
 0x3df   :  { %v354_v13 = vsub.f32 %v345_v4, %v350_v11 }
 0x3e0   :  { %v358_v14 = vmul.f32 1.442695, %v355_v10 }
 0x3e1   :  { %v356_v15 = vmul.f32 1.442695, %v354_v13  ;;  %v3002_v16 = vpop.permute.xlu1 %3001 }
 0x3e2   :  { %3079 = vpow2.f32 %v358_v14  ;;  %v3004_v18 = vunpack.i.h.bf16 %v3002_v16  ;;  %v3003_v21 = vunpack.i.l.bf16 %v3002_v16  ;;  %v462_v38 = vpop.permute.xlu0 %461 }
 0x3e3   :  { %3081 = vpow2.f32 %v356_v15 }
 0x3e4   :  { %v2870_v22 = vpack.c.bf16 %v3004_v18, %v3003_v21 }
 0x3e5   :  { %v3007_v23 = vpop.permute.xlu1 %3006 }
 0x3e6   :  { %v3009_v24 = vunpack.i.h.bf16 %v3007_v23  ;;  %v3008_v25 = vunpack.i.l.bf16 %v3007_v23  ;;  %2871 = vmatprep.subr.bf16.mxu1 %v2870_v22 }
 0x3e7   :  { %2873 = vmatpush3.bf16.msra.mxu1 %v2870_v22 }
 0x3e8   :  { %v2874_v26 = vpack.c.bf16 %v3009_v24, %v3008_v25 }
 0x3ea   :  { %2876 = vmatprep.subr.msk.bf16.mxu1 %vm3318_vm3, %v2874_v26 }
 0x3ec   :  { %v3080_v27 = vpop.eup %3079 }
 0x3ed   :  { %v363_v28 = vsel %vm347_vm4, %v3080_v27, 0.0  ;;  %v3082_v29 = vpop.eup %3081 }
 0x3ee   :  { %364 = vadd.xlane.f32.xlu1 %v363_v28  ;;  %v360_v30 = vsel %vm347_vm4, %v3082_v29, 0.0 }
 0x3f2   :  { %361 = vadd.xlane.f32.xlu1 %v360_v30 }
 0x403   :  { %459 = vrot.lane.b32.xlu1 %v3306_v57, %s3164_s9 }
 0x47b   :  { %v365_v31 = vpop.xlane.xlu1 %364 }
 0x47c   :  { %3083 = vrcp.f32 %v365_v31 }
 0x47f   :  { %v362_v32 = vpop.xlane.xlu1 %361 }
 0x480   :  { %3085 = vrcp.f32 %v362_v32 }
 0x483   :  { %v460_v37 = vpop.permute.xlu1 %459 }
 0x486   :  { %v3084_v33 = vpop.eup %3083 }
 0x487   :  { %v369_v36 = vmul.f32 %v3084_v33, %v3080_v27 }
 0x48a   :  { %v3086_v34 = vpop.eup %3085 }
 0x48b   :  { %v368_v35 = vmul.f32 %v3086_v34, %v3082_v29 }
 0x48d   :  { %2689 = vmatprep.mubr.msk.f32.mxu1 %vm347_vm4, %v368_v35 }
 0x48e   :  { %2690 = vmatmul.mubr.msk.f32.vlgmr.msra.gmra.mrb[4].mxu1 %vm347_vm4, %v369_v36 }
 0x48f   :  { %2879 = vmatpush3.bf16.xpose.msk.msra.mxu1 %vm3318_vm3, %v2874_v26  ;;  %2696 = vmatprep.mubr.msk.f32.mxu1 %vm261_vm2, %v460_v37 }
 0x496   :  { %2697 = vmatmul.mubr.msk.f32.vlgmr.msra.gmra.mrb[6].mxu1 %vm261_vm2, %v462_v38 }
 0x561   :  { %v2691_v39 = vpop.f32.mrb[4].mxu1 }
 0x562   :  { %458 = vst.msk [vmem:[#allocation2 + $0x8] sm:$0xff] %vm261_vm2, %v2691_v39  ;;  %v448_v40 = vpop.f32.mrb[5].mxu1 }
 0x563   :  { %457 = vst.msk [vmem:[#allocation2] sm:$0xff] %vm261_vm2, %v448_v40 }
 0x569   :  { %v2698_v41 = vpop.f32.mrb[6].mxu1 }
 0x56a   :  { %v551_v42 = vmul.f32 0.35355338, %v2698_v41  ;;  %v541_v43 = vpop.f32.mrb[7].mxu1 }
 0x56b   :  { %v550_v44 = vmul.f32 0.35355338, %v541_v43 }
 0x56c   :  { %v555_v45 = vsel %vm347_vm4, %v551_v42, -inf }
 0x56d   :  { %556 = vmax.xlane.f32.xlu0 %v555_v45  ;;  %v552_v46 = vsel %vm347_vm4, %v550_v44, -inf }
 0x56e   :  { %553 = vmax.xlane.f32.xlu1 %v552_v46 }
 0x57f   :  { %3011 = vrot.lane.b32.xlu1 %v3312_v58, %s3165_s10 }
 0x583   :  { %3016 = vrot.lane.b32.xlu0 %v3312_v58, %s3166_s11  ;;  %672 = vrot.lane.b32.xlu1 %v3306_v57, %s3167_s12 }
 0x5fa   :  { %v557_v47 = vpop.xlane.xlu0 %556 }
 0x5fb   :  { %v559_v48 = vsub.f32 %v551_v42, %v557_v47  ;;  %v554_v49 = vpop.xlane.xlu1 %553 }
 0x5fc   :  { %v558_v50 = vsub.f32 %v550_v44, %v554_v49 }
 0x5fd   :  { %v562_v51 = vmul.f32 1.442695, %v559_v48 }
 0x5fe   :  { %v560_v52 = vmul.f32 1.442695, %v558_v50  ;;  %v3017_v54 = vpop.permute.xlu0 %3016 }
 0x5ff   :  { %3087 = vpow2.f32 %v562_v51  ;;  %v3012_v56 = vpop.permute.xlu1 %3011  ;;  %v3019_v59 = vunpack.i.h.bf16 %v3017_v54  ;;  %v3018_v60 = vunpack.i.l.bf16 %v3017_v54 }
 0x600   :  { %v3014_v61 = vunpack.i.h.bf16 %v3012_v56  ;;  %v3013_v63 = vunpack.i.l.bf16 %v3012_v56  ;;  %3089 = vpow2.f32 %v560_v52 }
 0x601   :  { %v2884_v1 = vpack.c.bf16 %v3019_v59, %v3018_v60 }
 0x602   :  { %v2880_v0 = vpack.c.bf16 %v3014_v61, %v3013_v63 }
 0x603   :  { %v673_v8 = vpop.permute.xlu1 %672 }
 0x604   :  { %2881 = vmatprep.subr.bf16.mxu0 %v2880_v0 }
 0x605   :  { %2883 = vmatpush3.bf16.msra.mxu0 %v2880_v0 }
 0x606   :  { %2886 = vmatprep.subr.msk.bf16.mxu0 %vm3318_vm3, %v2884_v1 }
 0x609   :  { %v3088_v2 = vpop.eup %3087 }
 0x60a   :  { %v567_v4 = vsel %vm347_vm4, %v3088_v2, 0.0  ;;  %v3090_v6 = vpop.eup %3089 }
 0x60b   :  { %568 = vadd.xlane.f32.xlu1 %v567_v4  ;;  %v564_v7 = vsel %vm347_vm4, %v3090_v6, 0.0 }
 0x60f   :  { %565 = vadd.xlane.f32.xlu1 %v564_v7 }
 0x620   :  { %674 = vrot.lane.b32.xlu1 %v3303_v55, %s3167_s12 }
 0x698   :  { %v569_v10 = vpop.xlane.xlu1 %568 }
 0x699   :  { %3091 = vrcp.f32 %v569_v10 }
 0x69c   :  { %v566_v11 = vpop.xlane.xlu1 %565 }
 0x69d   :  { %3093 = vrcp.f32 %v566_v11  ;;  %v2500_v11 = vld [vmem:[%s3715_s0 + $0x10] sm:$0xff] }
 0x6a0   :  { %v675_v18 = vpop.permute.xlu1 %674 }
 0x6a3   :  { %v3092_v13 = vpop.eup %3091 }
 0x6a4   :  { %v573_v16 = vmul.f32 %v3092_v13, %v3088_v2  ;;  %v2501_v13 = vld [vmem:[%s3715_s0 + $0x18] sm:$0xff]  ;;  %s3174_s0 = smov 24  }
 0x6a7   :  { %v3094_v14 = vpop.eup %3093 }
 0x6a8   :  { %v572_v15 = vmul.f32 %v3094_v14, %v3090_v6 }
 0x6aa   :  { %2703 = vmatprep.mubr.msk.f32.mxu0 %vm347_vm4, %v572_v15 }
 0x6ab   :  { %2704 = vmatmul.mubr.msk.f32.vlgmr.msra.gmra.mrb[2].mxu0 %vm347_vm4, %v573_v16 }
 0x6ac   :  { %2889 = vmatpush3.bf16.xpose.msk.msra.mxu0 %vm3318_vm3, %v2884_v1  ;;  %2710 = vmatprep.mubr.msk.f32.mxu0 %vm261_vm2, %v673_v8 }
 0x6b3   :  { %2711 = vmatmul.mubr.msk.f32.vlgmr.msra.gmra.mrb[4].mxu0 %vm261_vm2, %v675_v18 }
 0x77e   :  { %v3370_v21 = vpop.f32.mrb[2].mxu0 }
 0x77f   :  { %v3372_v22 = vpop.f32.mrb[3].mxu0 }
 0x786   :  { %v2712_v23 = vpop.f32.mrb[4].mxu0 }
 0x787   :  { %v764_v24 = vmul.f32 0.35355338, %v2712_v23  ;;  %v754_v25 = vpop.f32.mrb[5].mxu0 }
 0x788   :  { %v763_v26 = vmul.f32 0.35355338, %v754_v25 }
 0x789   :  { %v768_v27 = vsel %vm347_vm4, %v764_v24, -inf }
 0x78a   :  { %769 = vmax.xlane.f32.xlu0 %v768_v27  ;;  %v765_v28 = vsel %vm347_vm4, %v763_v26, -inf }
 0x78b   :  { %766 = vmax.xlane.f32.xlu1 %v765_v28 }
 0x817   :  { %v770_v29 = vpop.xlane.xlu0 %769 }
 0x818   :  { %v772_v30 = vsub.f32 %v764_v24, %v770_v29  ;;  %v767_v31 = vpop.xlane.xlu1 %766 }
 0x819   :  { %v771_v32 = vsub.f32 %v763_v26, %v767_v31 }
 0x81a   :  { %v775_v33 = vmul.f32 1.442695, %v772_v30 }
 0x81b   :  { %v773_v34 = vmul.f32 1.442695, %v771_v32 }
 0x81c   :  { %3095 = vpow2.f32 %v775_v33 }
 0x81d   :  { %3097 = vpow2.f32 %v773_v34 }
 0x826   :  { %v3096_v35 = vpop.eup %3095 }
 0x827   :  { %v3098_v36 = vpop.eup %3097  ;;  %v780_v37 = vsel %vm347_vm4, %v3096_v35, 0.0 }
 0x828   :  { %781 = vadd.xlane.f32.xlu1 %v780_v37  ;;  %v777_v38 = vsel %vm347_vm4, %v3098_v36, 0.0 }
 0x829   :  { %778 = vadd.xlane.f32.xlu0 %v777_v38 }
 0x839   :  { %3026 = vrot.lane.b32.xlu1 %v3312_v58, %s3168_s13 }
 0x83d   :  { %885 = vrot.lane.b32.xlu1 %v3306_v57, %s3169_s14 }
 0x83f   :  { %3021 = vrot.lane.b32.xlu0 %v3312_v58, %s3170_s15 }
 0x843   :  { %887 = vrot.lane.b32.xlu0 %v3303_v55, %s3169_s14 }
 0x8b5   :  { %v782_v39 = vpop.xlane.xlu1 %781 }
 0x8b6   :  { %3099 = vrcp.f32 %v782_v39  ;;  %v779_v40 = vpop.xlane.xlu0 %778 }
 0x8b7   :  { %3101 = vrcp.f32 %v779_v40 }
 0x8b9   :  { %v3027_v41 = vpop.permute.xlu1 %3026 }
 0x8ba   :  { %v3022_v42 = vpop.permute.xlu0 %3021  ;;  %v3029_v43 = vunpack.i.h.bf16 %v3027_v41  ;;  %v3028_v44 = vunpack.i.l.bf16 %v3027_v41 }
 0x8bb   :  { %v3024_v45 = vunpack.i.h.bf16 %v3022_v42  ;;  %v3023_v46 = vunpack.i.l.bf16 %v3022_v42 }
 0x8bc   :  { %v2894_v48 = vpack.c.bf16 %v3029_v43, %v3028_v44 }
 0x8bd   :  { %v2890_v47 = vpack.c.bf16 %v3024_v45, %v3023_v46  ;;  %v886_v51 = vpop.permute.xlu1 %885 }
 0x8be   :  { %v888_v52 = vpop.permute.xlu0 %887 }
 0x8bf   :  { %2891 = vmatprep.subr.bf16.mxu1 %v2890_v47 }
 0x8c0   :  { %v3100_v57 = vpop.eup %3099  ;;  %2893 = vmatpush3.bf16.msra.mxu1 %v2890_v47 }
 0x8c1   :  { %v3102_v49 = vpop.eup %3101  ;;  %2896 = vmatprep.subr.msk.bf16.mxu1 %vm3318_vm3, %v2894_v48  ;;  %v786_v50 = vmul.f32 %v3100_v57, %v3096_v35 }
 0x8c2   :  { %v785_v55 = vmul.f32 %v3102_v49, %v3098_v36 }
 0x8c4   :  { %2717 = vmatprep.mubr.msk.f32.mxu1 %vm347_vm4, %v785_v55 }
 0x8c5   :  { %2718 = vmatmul.mubr.msk.f32.vlgmr.msra.gmra.mrb[8].mxu1 %vm347_vm4, %v786_v50 }
 0x8c6   :  { %2724 = vmatprep.mubr.msk.f32.mxu1 %vm261_vm2, %v886_v51 }
 0x8c9   :  { %2899 = vmatpush3.bf16.xpose.msk.msra.mxu1 %vm3318_vm3, %v2894_v48 }
 0x8ca   :  { %2911 = vmatprep.subr.bf16.mxu1 %v3225_v3 }
 0x8d0   :  { %2725 = vmatmul.mubr.msk.f32.vlgmr.msra.gmra.mrb[10].mxu1 %vm261_vm2, %v888_v52 }
 0x8d1   :  { %2913 = vmatpush3.bf16.msra.mxu1 %v3225_v3  ;;  %2760 = vmatprep.mubr.msk.f32.mxu1 %vm56_vm0, %v2500_v11 }
 0x8d2   :  { %2915 = vmatprep.subr.bf16.mxu1 %v3230_v5 }
 0x8d5   :  { %2917 = vmatpush3.bf16.msra.mxu1 %v3230_v5 }
 0x8d6   :  { %2919 = vmatprep.subr.bf16.mxu1 %v3245_v9 }
 0x8d9   :  { %2921 = vmatpush3.bf16.msra.mxu1 %v3245_v9 }
 0x8da   :  { %2923 = vmatprep.subr.bf16.mxu1 %v3255_v12 }
 0x8dd   :  { %2925 = vmatpush3.bf16.msra.mxu1 %v3255_v12 }
 0x8e0   :  { %2761 = vmatmul.mubr.msk.f32.vlgmr.msra.gmra.mrb[12].mxu1 %vm56_vm0, %v2501_v13 }
 0x998   :  { %v2719_v54 = vpop.f32.mrb[8].mxu1 }
 0x999   :  { %v865_v56 = vpop.f32.mrb[9].mxu1 }
 0x9a3   :  { %v2726_v59 = vpop.f32.mrb[10].mxu1 }
 0x9a4   :  { %v977_v60 = vmul.f32 0.35355338, %v2726_v59  ;;  %v967_v61 = vpop.f32.mrb[11].mxu1 }
 0x9a5   :  { %v976_v63 = vmul.f32 0.35355338, %v967_v61 }
 0x9a6   :  { %v981_v3 = vsel %vm347_vm4, %v977_v60, -inf }
 0x9a7   :  { %982 = vmax.xlane.f32.xlu0 %v981_v3  ;;  %v978_v0 = vsel %vm347_vm4, %v976_v63, -inf }
 0x9a8   :  { %979 = vmax.xlane.f32.xlu1 %v978_v0 }
 0x9b3   :  { %v2762_v30 = vpop.f32.mrb[12].mxu1 }
 0x9b4   :  { %v1360_v31 = vadd.f32 %v2762_v30, %v3287_v20  ;;  %v1354_v32 = vpop.f32.mrb[13].mxu1 }
 0x9b5   :  { %v1355_v33 = vadd.f32 %v3287_v20, %v1354_v32 }
 0x9b6   :  { %v1364_v34 = vsel %vm138_vm1, %v1360_v31, 0.0 }
 0x9b7   :  { %v1363_v35 = vsel %vm138_vm1, %v1355_v33, 0.0 }
 0x9b8   :  { %v1365_v36 = vadd.f32 %v1364_v34, %v1363_v35 }
 0x9ba   :  { %v1366_v37 = vrot.slane %v1365_v36, 4 }
 0x9bc   :  { %v1367_v38 = vadd.f32 %v1366_v37, %v1365_v36 }
 0x9be   :  { %v1368_v39 = vrot.slane %v1367_v38, 2 }
 0x9c0   :  { %v1369_v40 = vadd.f32 %v1368_v39, %v1367_v38 }
 0x9c2   :  { %v1370_v41 = vrot.slane %v1369_v40, 1 }
 0x9c4   :  { %v1371_v42 = vadd.f32 %v1370_v41, %v1369_v40 }
 0x9c6   :  { %v1372_v43 = vmul.f32 0.0625, %v1371_v42 }
 0x9c8   :  { %v1373_v44 = vsub.f32 %v1355_v33, %v1372_v43  ;;  %v1374_v45 = vsub.f32 %v1360_v31, %v1372_v43 }
 0x9ca   :  { %v1375_v46 = vmul.f32 %v1373_v44, %v1373_v44  ;;  %v1376_v47 = vmul.f32 %v1374_v45, %v1374_v45 }
 0x9cc   :  { %v1377_v48 = vsel %vm138_vm1, %v1375_v46, 0.0  ;;  %v1378_v20 = vsel %vm138_vm1, %v1376_v47, 0.0 }
 0x9cd   :  { %v1379_v57 = vadd.f32 %v1378_v20, %v1377_v48 }
 0x9cf   :  { %v1380_v49 = vrot.slane %v1379_v57, 4 }
 0x9d1   :  { %v1381_v55 = vadd.f32 %v1380_v49, %v1379_v57 }
 0x9d3   :  { %v1382_v50 = vrot.slane %v1381_v55, 2 }
 0x9d5   :  { %v1383_v51 = vadd.f32 %v1382_v50, %v1381_v55 }
 0x9d7   :  { %v1384_v52 = vrot.slane %v1383_v51, 1 }
 0xa34   :  { %v983_v5 = vpop.xlane.xlu0 %982 }
 0xa35   :  { %v985_v1 = vsub.f32 %v977_v60, %v983_v5  ;;  %v980_v2 = vpop.xlane.xlu1 %979  ;;  %v3438_v5 = vld [vmem:[%s3719_s5] sm:$0xff] }
 0xa36   :  { %v984_v9 = vsub.f32 %v976_v63, %v980_v2 }
 0xa37   :  { %v988_v4 = vmul.f32 1.442695, %v985_v1 }
 0xa38   :  { %v986_v6 = vmul.f32 1.442695, %v984_v9 }
 0xa39   :  { %3103 = vpow2.f32 %v988_v4 }
 0xa3a   :  { %3105 = vpow2.f32 %v986_v6 }
 0xa43   :  { %v3104_v12 = vpop.eup %3103 }
 0xa44   :  { %v3106_v7 = vpop.eup %3105  ;;  %v993_v8 = vsel %vm347_vm4, %v3104_v12, 0.0 }
 0xa45   :  { %994 = vadd.xlane.f32.xlu1 %v993_v8  ;;  %v990_v10 = vsel %vm347_vm4, %v3106_v7, 0.0  ;;  %v3464_v8 = vld [vmem:[%s3719_s5 + $0x10] sm:$0xff] }
 0xa46   :  { %991 = vadd.xlane.f32.xlu0 %v990_v10  ;;  %v3474_v10 = vld [vmem:[%s3719_s5 + $0x18] sm:$0xff] }
 0xa56   :  { %663 = vrot.lane.b32.xlu1 %v3372_v22, %s3171_s16 }
 0xa5a   :  { %665 = vrot.lane.b32.xlu1 %v3370_v21, %s3171_s16 }
 0xa5c   :  { %3031 = vrot.lane.b32.xlu0 %v3312_v58, %s3172_s17 }
 0xa5e   :  { %878 = vrot.lane.b32.xlu1 %v2719_v54, %s3173_s18  ;;  %v1385_v54 = vadd.f32 %v1384_v52, %v1383_v51 }
 0xa60   :  { %876 = vrot.lane.b32.xlu0 %v865_v56, %s3173_s18  ;;  %v1386_v56 = vmul.f32 0.0625, %v1385_v54 }
 0xa62   :  { %v1387_v59 = vadd.f32 1e-05, %v1386_v56 }
 0xad2   :  { %v995_v14 = vpop.xlane.xlu1 %994 }
 0xad3   :  { %3107 = vrcp.f32 %v995_v14  ;;  %v992_v58 = vpop.xlane.xlu0 %991 }
 0xad4   :  { %3109 = vrcp.f32 %v992_v58 }
 0xad5   :  { %3111 = vrsqrt.f32 %v1387_v59 }
 0xad6   :  { %v664_v15 = vpop.permute.xlu1 %663 }
 0xad7   :  { %670 = vst.msk [vmem:[#allocation2] sm:$0xff] %vm669_vm5, %v664_v15  ;;  %v3032_v16 = vpop.permute.xlu0 %3031 }
 0xad8   :  { %v3034_v18 = vunpack.i.h.bf16 %v3032_v16  ;;  %v3033_v21 = vunpack.i.l.bf16 %v3032_v16 }
 0xada   :  { %v2900_v22 = vpack.c.bf16 %v3034_v18, %v3033_v21  ;;  %v666_v23 = vpop.permute.xlu1 %665 }
 0xadb   :  { %671 = vst.msk [vmem:[#allocation2 + $0x8] sm:$0xff] %vm669_vm5, %v666_v23  ;;  %v877_v24 = vpop.permute.xlu0 %876 }
 0xadc   :  { %883 = vst.msk [vmem:[#allocation2] sm:$0xff] %vm882_vm6, %v877_v24  ;;  %2901 = vmatprep.subr.bf16.mxu0 %v2900_v22 }
 0xadd   :  { %v3108_v25 = vpop.eup %3107  ;;  %2903 = vmatpush3.bf16.msra.mxu0 %v2900_v22 }
 0xade   :  { %v3110_v26 = vpop.eup %3109  ;;  %v879_v27 = vpop.permute.xlu1 %878  ;;  %v999_v29 = vmul.f32 %v3108_v25, %v3104_v12 }
 0xadf   :  { %884 = vst.msk [vmem:[#allocation2 + $0x8] sm:$0xff] %vm882_vm6, %v879_v27  ;;  %v998_v28 = vmul.f32 %v3110_v26, %v3106_v7  ;;  %v3112_v60 = vpop.eup %3111  ;;  %v3459_v7 = vld [vmem:[%s3719_s5 + $0x8] sm:$0xff] }
 0xae0   :  { %v1389_v61 = vmul.f32 %v3112_v60, %v1373_v44  ;;  %v1390_v63 = vmul.f32 %v3112_v60, %v1374_v45 }
 0xae1   :  { %2731 = vmatprep.mubr.msk.f32.mxu0 %vm347_vm4, %v998_v28 }
 0xae2   :  { %2732 = vmatmul.mubr.msk.f32.vlgmr.msra.gmra.mrb[6].mxu0 %vm347_vm4, %v999_v29 }
 0xae3   :  { %2738 = vmatprep.mubr.msk.f32.mxu0 %vm138_vm1, %v3438_v5 }
 0xbb5   :  { %v2733_v3 = vpop.f32.mrb[6].mxu0 }
 0xbb6   :  { %1091 = vrot.lane.b32.xlu1 %v2733_v3, %s3174_s0  ;;  %v1078_v0 = vpop.f32.mrb[7].mxu0 }
 0xbb7   :  { %1089 = vrot.lane.b32.xlu0 %v1078_v0, %s3174_s0 }
 0xc28   :  { %v1092_v1 = vpop.permute.xlu1 %1091 }
 0xc29   :  { %1097 = vst.msk [vmem:[#allocation2 + $0x8] sm:$0xff] %vm1095_vm7, %v1092_v1  ;;  %v1090_v2 = vpop.permute.xlu0 %1089 }
 0xc2a   :  { %1096 = vst.msk [vmem:[#allocation2] sm:$0xff] %vm1095_vm7, %v1090_v2 }
 0xc30   :  { %v1099_v9 = vld [vmem:[#allocation2 + $0x8] sm:$0xff] }
 0xc31   :  { %v1098_v4 = vld [vmem:[#allocation2] sm:$0xff] }
 0xc32   :  { %v2904_v12 = vpack.c.bf16 %v1099_v9, %v1098_v4 }
 0xc34   :  { %2906 = vmatprep.subr.msk.bf16.mxu0 %vm3447_vm8, %v2904_v12 }
 0xc35   :  { %2909 = vmatpush3.bf16.xpose.msk.msra.mxu0 %vm3447_vm8, %v2904_v12 }
 0xc36   :  { %2927 = vmatprep.subr.bf16.mxu0 %v3273_v17 }
 0xc3c   :  { %2739 = vmatmul.mubr.msk.f32.vlgmr.msra.gmra.mrb[8].mxu0 %vm138_vm1, %v3459_v7 }
 0xc3d   :  { %2929 = vmatpush3.bf16.msra.mxu0 %v3273_v17  ;;  %2741 = vmatprep.mubr.msk.f32.mxu0 %vm138_vm1, %v3464_v8 }
 0xc3e   :  { %2931 = vmatprep.subr.bf16.mxu0 %v3278_v19 }
 0xc40   :  { %2742 = vmatmul.mubr.msk.f32.gmra.mrb[10].mxu0 %vm138_vm1, %v3474_v10 }
 0xc41   :  { %2933 = vmatpush3.bf16.msra.mxu0 %v3278_v19  ;;  %2771 = vmatprep.mubr.msk.f32.mxu0 %vm138_vm1, %v1389_v61 }
 0xc44   :  { %2772 = vmatmul.mubr.msk.f32.vlgmr.msra.gmra.mrb[12].mxu0 %vm138_vm1, %v1390_v63 }
 0xd0f   :  { %v3482_v17 = vpop.f32.mrb[8].mxu0 }
 0xd10   :  { %v3484_v11 = vpop.f32.mrb[9].mxu0 }
 0xd13   :  { %v3486_v13 = vpop.f32.mrb[10].mxu0 }
 0xd14   :  { %v3488_v14 = vpop.f32.mrb[11].mxu0 }
 0xd17   :  { %v2773_v58 = vpop.f32.mrb[12].mxu0 }
 0xd18   :  { %v3491_v15 = vadd.f32 %v2773_v58, %v3300_v53  ;;  %v1463_v16 = vpop.f32.mrb[13].mxu0 }
 0xd19   :  { %v3494_v18 = vadd.f32 %v3300_v53, %v1463_v16 }
 0xd1b   :  { %2778 = vmatprep.mubr.msk.f32.mxu0 %vm261_vm2, %v3494_v18  ;;  %v3500_v19 = vpack.i.bf16 %v3491_v15, %v3494_v18 }
 0xd1d   :  { %3036 = vrot.lane.b32.xlu0 %v3500_v19, %s3161_s30 }
 0xd8f   :  { %v3037_v21 = vpop.permute.xlu0 %3036 }
 0xd90   :  { %v3039_v22 = vunpack.i.h.bf16 %v3037_v21  ;;  %v3038_v23 = vunpack.i.l.bf16 %v3037_v21 }
 0xd92   :  { %v2934_v24 = vpack.c.bf16 %v3039_v22, %v3038_v23 }
 0xd94   :  { %2936 = vmatprep.subr.msk.bf16.mxu0 %vm3318_vm3, %v2934_v24 }
 0xd95   :  { %2939 = vmatpush3.bf16.xpose.msk.msra.mxu0 %vm3318_vm3, %v2934_v24 }
 0xd9c   :  { %2779 = vmatmul.mubr.msk.f32.vlgmr.msra.gmra.mrb[14].mxu0 %vm261_vm2, %v3491_v15 }
 0xe6f   :  { %v2780_v53 = vpop.f32.mrb[14].mxu0 }
 0xe70   :  { %v1562_v25 = vmul.f32 0.35355338, %v2780_v53  ;;  %v1552_v26 = vpop.f32.mrb[15].mxu0 }
 0xe71   :  { %v1561_v27 = vmul.f32 0.35355338, %v1552_v26 }
 0xe72   :  { %v1566_v28 = vsel %vm347_vm4, %v1562_v25, -inf }
 0xe73   :  { %1567 = vmax.xlane.f32.xlu0 %v1566_v28  ;;  %v1563_v29 = vsel %vm347_vm4, %v1561_v27, -inf }
 0xe74   :  { %1564 = vmax.xlane.f32.xlu1 %v1563_v29 }
 0xf00   :  { %v1568_v30 = vpop.xlane.xlu0 %1567 }
 0xf01   :  { %v1570_v31 = vsub.f32 %v1562_v25, %v1568_v30  ;;  %v1565_v32 = vpop.xlane.xlu1 %1564 }
 0xf02   :  { %v1569_v33 = vsub.f32 %v1561_v27, %v1565_v32 }
 0xf03   :  { %v1573_v34 = vmul.f32 1.442695, %v1570_v31 }
 0xf04   :  { %v1571_v35 = vmul.f32 1.442695, %v1569_v33 }
 0xf05   :  { %3113 = vpow2.f32 %v1573_v34 }
 0xf06   :  { %3115 = vpow2.f32 %v1571_v35 }
 0xf0f   :  { %v3114_v36 = vpop.eup %3113 }
 0xf10   :  { %v3116_v37 = vpop.eup %3115  ;;  %v1578_v38 = vsel %vm347_vm4, %v3114_v36, 0.0 }
 0xf11   :  { %1579 = vadd.xlane.f32.xlu1 %v1578_v38  ;;  %v1575_v39 = vsel %vm347_vm4, %v3116_v37, 0.0 }
 0xf12   :  { %1576 = vadd.xlane.f32.xlu0 %v1575_v39 }
 0xf22   :  { %3046 = vrot.lane.b32.xlu1 %v3500_v19, %s3163_s8 }
 0xf26   :  { %1674 = vrot.lane.b32.xlu1 %v3494_v18, %s3164_s9 }
 0xf28   :  { %3041 = vrot.lane.b32.xlu0 %v3500_v19, %s3162_s4 }
 0xf2c   :  { %1676 = vrot.lane.b32.xlu0 %v3491_v15, %s3164_s9 }
 0xf9e   :  { %v1580_v40 = vpop.xlane.xlu1 %1579 }
 0xf9f   :  { %3117 = vrcp.f32 %v1580_v40  ;;  %v1577_v41 = vpop.xlane.xlu0 %1576 }
 0xfa0   :  { %3119 = vrcp.f32 %v1577_v41 }
 0xfa2   :  { %v3047_v42 = vpop.permute.xlu1 %3046 }
 0xfa3   :  { %v3042_v43 = vpop.permute.xlu0 %3041  ;;  %v3049_v44 = vunpack.i.h.bf16 %v3047_v42  ;;  %v3048_v45 = vunpack.i.l.bf16 %v3047_v42 }
 0xfa4   :  { %v3044_v46 = vunpack.i.h.bf16 %v3042_v43  ;;  %v3043_v47 = vunpack.i.l.bf16 %v3042_v43 }
 0xfa5   :  { %v2944_v20 = vpack.c.bf16 %v3049_v44, %v3048_v45 }
 0xfa6   :  { %v2940_v48 = vpack.c.bf16 %v3044_v46, %v3043_v47  ;;  %v1675_v51 = vpop.permute.xlu1 %1674 }
 0xfa7   :  { %v1677_v52 = vpop.permute.xlu0 %1676 }
 0xfa8   :  { %2941 = vmatprep.subr.bf16.mxu1 %v2940_v48 }
 0xfa9   :  { %v3118_v57 = vpop.eup %3117  ;;  %2943 = vmatpush3.bf16.msra.mxu1 %v2940_v48 }
 0xfaa   :  { %v3120_v49 = vpop.eup %3119  ;;  %2946 = vmatprep.subr.msk.bf16.mxu1 %vm3318_vm3, %v2944_v20  ;;  %v1584_v50 = vmul.f32 %v3118_v57, %v3114_v36 }
 0xfab   :  { %v1583_v55 = vmul.f32 %v3120_v49, %v3116_v37 }
 0xfad   :  { %2785 = vmatprep.mubr.msk.f32.mxu1 %vm347_vm4, %v1583_v55 }
 0xfae   :  { %2786 = vmatmul.mubr.msk.f32.vlgmr.msra.gmra.mrb[14].mxu1 %vm347_vm4, %v1584_v50 }
 0xfaf   :  { %2792 = vmatprep.mubr.msk.f32.mxu1 %vm261_vm2, %v1675_v51 }
 0xfb2   :  { %2949 = vmatpush3.bf16.xpose.msk.msra.mxu1 %vm3318_vm3, %v2944_v20 }
 0xfb9   :  { %2793 = vmatmul.mubr.msk.f32.vlgmr.msra.gmra.mrb[16].mxu1 %vm261_vm2, %v1677_v52 }
0x1081   :  { %v2787_v54 = vpop.f32.mrb[14].mxu1 }
0x1082   :  { %1673 = vst.msk [vmem:[#allocation2 + $0x8] sm:$0xff] %vm261_vm2, %v2787_v54  ;;  %v1663_v56 = vpop.f32.mrb[15].mxu1 }
0x1083   :  { %1672 = vst.msk [vmem:[#allocation2] sm:$0xff] %vm261_vm2, %v1663_v56 }
0x108c   :  { %v2794_v59 = vpop.f32.mrb[16].mxu1 }
0x108d   :  { %v1766_v60 = vmul.f32 0.35355338, %v2794_v59  ;;  %v1756_v61 = vpop.f32.mrb[17].mxu1 }
0x108e   :  { %v1765_v63 = vmul.f32 0.35355338, %v1756_v61 }
0x108f   :  { %v1770_v3 = vsel %vm347_vm4, %v1766_v60, -inf }
0x1090   :  { %1771 = vmax.xlane.f32.xlu0 %v1770_v3  ;;  %v1767_v0 = vsel %vm347_vm4, %v1765_v63, -inf }
0x1091   :  { %1768 = vmax.xlane.f32.xlu1 %v1767_v0 }
0x111d   :  { %v1772_v1 = vpop.xlane.xlu0 %1771 }
0x111e   :  { %v1774_v2 = vsub.f32 %v1766_v60, %v1772_v1  ;;  %v1769_v9 = vpop.xlane.xlu1 %1768 }
0x111f   :  { %v1773_v4 = vsub.f32 %v1765_v63, %v1769_v9 }
0x1120   :  { %v1777_v12 = vmul.f32 1.442695, %v1774_v2 }
0x1121   :  { %v1775_v58 = vmul.f32 1.442695, %v1773_v4 }
0x1122   :  { %3121 = vpow2.f32 %v1777_v12 }
0x1123   :  { %3123 = vpow2.f32 %v1775_v58 }
0x112c   :  { %v3122_v16 = vpop.eup %3121 }
0x112d   :  { %v3124_v21 = vpop.eup %3123  ;;  %v1782_v22 = vsel %vm347_vm4, %v3122_v16, 0.0 }
0x112e   :  { %1783 = vadd.xlane.f32.xlu1 %v1782_v22  ;;  %v1779_v23 = vsel %vm347_vm4, %v3124_v21, 0.0 }
0x112f   :  { %1780 = vadd.xlane.f32.xlu0 %v1779_v23 }
0x113f   :  { %3056 = vrot.lane.b32.xlu1 %v3500_v19, %s3166_s11 }
0x1143   :  { %1886 = vrot.lane.b32.xlu1 %v3494_v18, %s3167_s12 }
0x1145   :  { %3051 = vrot.lane.b32.xlu0 %v3500_v19, %s3165_s10 }
0x1149   :  { %1888 = vrot.lane.b32.xlu0 %v3491_v15, %s3167_s12 }
0x11bb   :  { %v1784_v24 = vpop.xlane.xlu1 %1783 }
0x11bc   :  { %3125 = vrcp.f32 %v1784_v24  ;;  %v1781_v53 = vpop.xlane.xlu0 %1780 }
0x11bd   :  { %3127 = vrcp.f32 %v1781_v53 }
0x11bf   :  { %v3057_v25 = vpop.permute.xlu1 %3056 }
0x11c0   :  { %v3052_v26 = vpop.permute.xlu0 %3051  ;;  %v3059_v27 = vunpack.i.h.bf16 %v3057_v25  ;;  %v3058_v28 = vunpack.i.l.bf16 %v3057_v25 }
0x11c1   :  { %v3054_v29 = vunpack.i.h.bf16 %v3052_v26  ;;  %v3053_v30 = vunpack.i.l.bf16 %v3052_v26 }
0x11c2   :  { %v2954_v32 = vpack.c.bf16 %v3059_v27, %v3058_v28 }
0x11c3   :  { %v2950_v31 = vpack.c.bf16 %v3054_v29, %v3053_v30  ;;  %v1887_v37 = vpop.permute.xlu1 %1886 }
0x11c4   :  { %v1889_v38 = vpop.permute.xlu0 %1888 }
0x11c5   :  { %2951 = vmatprep.subr.bf16.mxu0 %v2950_v31 }
0x11c6   :  { %v3126_v33 = vpop.eup %3125  ;;  %2953 = vmatpush3.bf16.msra.mxu0 %v2950_v31 }
0x11c7   :  { %v3128_v34 = vpop.eup %3127  ;;  %2956 = vmatprep.subr.msk.bf16.mxu0 %vm3318_vm3, %v2954_v32  ;;  %v1788_v36 = vmul.f32 %v3126_v33, %v3122_v16 }
0x11c8   :  { %v1787_v35 = vmul.f32 %v3128_v34, %v3124_v21 }
0x11ca   :  { %2799 = vmatprep.mubr.msk.f32.mxu0 %vm347_vm4, %v1787_v35 }
0x11cb   :  { %2800 = vmatmul.mubr.msk.f32.vlgmr.msra.gmra.mrb[16].mxu0 %vm347_vm4, %v1788_v36 }
0x11cc   :  { %2806 = vmatprep.mubr.msk.f32.mxu0 %vm261_vm2, %v1887_v37 }
0x11cf   :  { %2959 = vmatpush3.bf16.xpose.msk.msra.mxu0 %vm3318_vm3, %v2954_v32 }
0x11d6   :  { %2807 = vmatmul.mubr.msk.f32.vlgmr.msra.gmra.mrb[18].mxu0 %vm261_vm2, %v1889_v38 }
0x129e   :  { %v3552_v39 = vpop.f32.mrb[16].mxu0 }
0x129f   :  { %v3554_v40 = vpop.f32.mrb[17].mxu0 }
0x12a9   :  { %v2808_v41 = vpop.f32.mrb[18].mxu0 }
0x12aa   :  { %v1978_v42 = vmul.f32 0.35355338, %v2808_v41  ;;  %v1968_v43 = vpop.f32.mrb[19].mxu0 }
0x12ab   :  { %v1977_v44 = vmul.f32 0.35355338, %v1968_v43 }
0x12ac   :  { %v1982_v45 = vsel %vm347_vm4, %v1978_v42, -inf }
0x12ad   :  { %1983 = vmax.xlane.f32.xlu0 %v1982_v45  ;;  %v1979_v46 = vsel %vm347_vm4, %v1977_v44, -inf }
0x12ae   :  { %1980 = vmax.xlane.f32.xlu1 %v1979_v46 }
0x133a   :  { %v1984_v47 = vpop.xlane.xlu0 %1983 }
0x133b   :  { %v1986_v48 = vsub.f32 %v1978_v42, %v1984_v47  ;;  %v1981_v20 = vpop.xlane.xlu1 %1980 }
0x133c   :  { %v1985_v57 = vsub.f32 %v1977_v44, %v1981_v20 }
0x133d   :  { %v1989_v49 = vmul.f32 1.442695, %v1986_v48 }
0x133e   :  { %v1987_v55 = vmul.f32 1.442695, %v1985_v57  ;;  %v3175_v57 = vmov 0  }
0x133f   :  { %3129 = vpow2.f32 %v1989_v49  ;;  %3076 = vset.pattern.permute.xlu1 %v3175_v57  ;;  %3075 = vset.pattern.permute.xlu0 %v3175_v57 }
0x1340   :  { %3131 = vpow2.f32 %v1987_v55 }
0x1349   :  { %v3130_v50 = vpop.eup %3129 }
0x134a   :  { %v3132_v51 = vpop.eup %3131  ;;  %v1994_v52 = vsel %vm347_vm4, %v3130_v50, 0.0 }
0x134b   :  { %1995 = vadd.xlane.f32.xlu1 %v1994_v52  ;;  %v1991_v54 = vsel %vm347_vm4, %v3132_v51, 0.0  ;;  %v47_v52 = vld [vmem:[%s3720_s6 + $0x18] sm:$0xff] }
0x134c   :  { %1992 = vadd.xlane.f32.xlu0 %v1991_v54 }
0x135c   :  { %3066 = vrot.lane.b32.xlu1 %v3500_v19, %s3168_s13 }
0x1360   :  { %2098 = vrot.lane.b32.xlu1 %v3494_v18, %s3169_s14 }
0x1362   :  { %3061 = vrot.lane.b32.xlu0 %v3500_v19, %s3170_s15 }
0x1366   :  { %2100 = vrot.lane.b32.xlu0 %v3491_v15, %s3169_s14 }
0x13d8   :  { %v1996_v56 = vpop.xlane.xlu1 %1995 }
0x13d9   :  { %3133 = vrcp.f32 %v1996_v56  ;;  %v1993_v59 = vpop.xlane.xlu0 %1992 }
0x13da   :  { %3135 = vrcp.f32 %v1993_v59 }
0x13dc   :  { %v3067_v60 = vpop.permute.xlu1 %3066 }
0x13dd   :  { %v3062_v61 = vpop.permute.xlu0 %3061  ;;  %v3069_v63 = vunpack.i.h.bf16 %v3067_v60  ;;  %v3068_v3 = vunpack.i.l.bf16 %v3067_v60 }
0x13de   :  { %v3064_v0 = vunpack.i.h.bf16 %v3062_v61  ;;  %v3063_v1 = vunpack.i.l.bf16 %v3062_v61 }
0x13df   :  { %v2964_v9 = vpack.c.bf16 %v3069_v63, %v3068_v3 }
0x13e0   :  { %v2960_v2 = vpack.c.bf16 %v3064_v0, %v3063_v1  ;;  %v2099_v58 = vpop.permute.xlu1 %2098 }
0x13e1   :  { %v2101_v16 = vpop.permute.xlu0 %2100 }
0x13e2   :  { %2961 = vmatprep.subr.bf16.mxu1 %v2960_v2 }
0x13e3   :  { %v3134_v18 = vpop.eup %3133  ;;  %2963 = vmatpush3.bf16.msra.mxu1 %v2960_v2 }
0x13e4   :  { %v3136_v4 = vpop.eup %3135  ;;  %2966 = vmatprep.subr.msk.bf16.mxu1 %vm3318_vm3, %v2964_v9  ;;  %v2000_v12 = vmul.f32 %v3134_v18, %v3130_v50  ;;  %v45_v50 = vld [vmem:[%s3720_s6 + $0x8] sm:$0xff] }
0x13e5   :  { %v1999_v15 = vmul.f32 %v3136_v4, %v3132_v51  ;;  %v44_v51 = vld [vmem:[%s3720_s6] sm:$0xff] }
0x13e7   :  { %2813 = vmatprep.mubr.msk.f32.mxu1 %vm347_vm4, %v1999_v15 }
0x13e8   :  { %2814 = vmatmul.mubr.msk.f32.vlgmr.msra.gmra.mrb[18].mxu1 %vm347_vm4, %v2000_v12 }
0x13e9   :  { %2820 = vmatprep.mubr.msk.f32.mxu1 %vm261_vm2, %v2099_v58 }
0x13ec   :  { %2969 = vmatpush3.bf16.xpose.msk.msra.mxu1 %vm3318_vm3, %v2964_v9 }
0x13f3   :  { %2821 = vmatmul.mubr.msk.f32.vlgmr.msra.gmra.mrb[20].mxu1 %vm261_vm2, %v2101_v16 }
0x14bb   :  { %v2815_v21 = vpop.f32.mrb[18].mxu1 }
0x14bc   :  { %v2079_v22 = vpop.f32.mrb[19].mxu1 }
0x14c6   :  { %v2822_v23 = vpop.f32.mrb[20].mxu1 }
0x14c7   :  { %v2190_v24 = vmul.f32 0.35355338, %v2822_v23  ;;  %v2180_v53 = vpop.f32.mrb[21].mxu1 }
0x14c8   :  { %v2189_v25 = vmul.f32 0.35355338, %v2180_v53 }
0x14c9   :  { %v2194_v26 = vsel %vm347_vm4, %v2190_v24, -inf }
0x14ca   :  { %2195 = vmax.xlane.f32.xlu0 %v2194_v26  ;;  %v2191_v27 = vsel %vm347_vm4, %v2189_v25, -inf }
0x14cb   :  { %2192 = vmax.xlane.f32.xlu1 %v2191_v27 }
0x1557   :  { %v2196_v28 = vpop.xlane.xlu0 %2195 }
0x1558   :  { %v2198_v29 = vsub.f32 %v2190_v24, %v2196_v28  ;;  %v2193_v30 = vpop.xlane.xlu1 %2192 }
0x1559   :  { %v2197_v62 = vsub.f32 %v2189_v25, %v2193_v30 }
0x155a   :  { %v2201_v31 = vmul.f32 1.442695, %v2198_v29 }
0x155b   :  { %v2199_v32 = vmul.f32 1.442695, %v2197_v62 }
0x155c   :  { %3137 = vpow2.f32 %v2201_v31 }
0x155d   :  { %3139 = vpow2.f32 %v2199_v32 }
0x1566   :  { %v3138_v33 = vpop.eup %3137 }
0x1567   :  { %v3140_v34 = vpop.eup %3139  ;;  %v2206_v35 = vsel %vm347_vm4, %v3138_v33, 0.0 }
0x1568   :  { %2207 = vadd.xlane.f32.xlu1 %v2206_v35  ;;  %v2203_v36 = vsel %vm347_vm4, %v3140_v34, 0.0 }
0x1569   :  { %2204 = vadd.xlane.f32.xlu0 %v2203_v36 }
0x1579   :  { %1878 = vrot.lane.b32.xlu1 %v3554_v40, %s3171_s16 }
0x157d   :  { %1880 = vrot.lane.b32.xlu1 %v3552_v39, %s3171_s16 }
0x157f   :  { %3071 = vrot.lane.b32.xlu0 %v3500_v19, %s3172_s17 }
0x1581   :  { %2092 = vrot.lane.b32.xlu1 %v2815_v21, %s3173_s18 }
0x1583   :  { %2090 = vrot.lane.b32.xlu0 %v2079_v22, %s3173_s18 }
0x15f5   :  { %v2208_v37 = vpop.xlane.xlu1 %2207 }
0x15f6   :  { %3141 = vrcp.f32 %v2208_v37  ;;  %v2205_v38 = vpop.xlane.xlu0 %2204 }
0x15f7   :  { %3143 = vrcp.f32 %v2205_v38 }
0x15f9   :  { %v1879_v41 = vpop.permute.xlu1 %1878 }
0x15fa   :  { %1884 = vst.msk [vmem:[#allocation2] sm:$0xff] %vm669_vm5, %v1879_v41  ;;  %v3072_v42 = vpop.permute.xlu0 %3071 }
0x15fb   :  { %v3074_v43 = vunpack.i.h.bf16 %v3072_v42  ;;  %v3073_v40 = vunpack.i.l.bf16 %v3072_v42 }
0x15fd   :  { %v2970_v44 = vpack.c.bf16 %v3074_v43, %v3073_v40  ;;  %v1881_v45 = vpop.permute.xlu1 %1880 }
0x15fe   :  { %1885 = vst.msk [vmem:[#allocation2 + $0x8] sm:$0xff] %vm669_vm5, %v1881_v45  ;;  %v2091_v39 = vpop.permute.xlu0 %2090 }
0x15ff   :  { %2096 = vst.msk [vmem:[#allocation2] sm:$0xff] %vm882_vm6, %v2091_v39  ;;  %2971 = vmatprep.subr.bf16.mxu0 %v2970_v44 }
0x1600   :  { %v3142_v19 = vpop.eup %3141  ;;  %2973 = vmatpush3.bf16.msra.mxu0 %v2970_v44 }
0x1601   :  { %v3144_v46 = vpop.eup %3143  ;;  %v2093_v47 = vpop.permute.xlu1 %2092  ;;  %v2212_v20 = vmul.f32 %v3142_v19, %v3138_v33 }
0x1602   :  { %2097 = vst.msk [vmem:[#allocation2 + $0x8] sm:$0xff] %vm882_vm6, %v2093_v47  ;;  %v2211_v48 = vmul.f32 %v3144_v46, %v3140_v34 }
0x1604   :  { %2827 = vmatprep.mubr.msk.f32.mxu0 %vm347_vm4, %v2211_v48 }
0x1605   :  { %2828 = vmatmul.mubr.msk.f32.vlgmr.msra.gmra.mrb[20].mxu0 %vm347_vm4, %v2212_v20 }
0x1606   :  { %2834 = vmatprep.mubr.msk.f32.mxu0 %vm138_vm1, %v3438_v5  ;;  %v46_v5 = vld [vmem:[%s3720_s6 + $0x10] sm:$0xff] }
0x16d8   :  { %v2829_v49 = vpop.f32.mrb[20].mxu0 }
0x16d9   :  { %2304 = vrot.lane.b32.xlu1 %v2829_v49, %s3174_s0  ;;  %v2291_v55 = vpop.f32.mrb[21].mxu0 }
0x16da   :  { %2302 = vrot.lane.b32.xlu0 %v2291_v55, %s3174_s0 }
0x16dd   :  { %1107 = vperm.xlu1 %3076, %v45_v50  }
0x16de   :  { %1102 = vperm.xlu0 %3075, %v44_v51  }
0x16e1   :  { %1112 = vperm.xlu1 %3076, %v46_v5  }
0x16e2   :  { %1117 = vperm.xlu0 %3075, %v47_v52  }
0x174b   :  { %v2305_v54 = vpop.permute.xlu1 %2304 }
0x174c   :  { %2309 = vst.msk [vmem:[#allocation2 + $0x8] sm:$0xff] %vm1095_vm7, %v2305_v54  ;;  %v2303_v56 = vpop.permute.xlu0 %2302 }
0x174d   :  { %2308 = vst.msk [vmem:[#allocation2] sm:$0xff] %vm1095_vm7, %v2303_v56 }
0x1753   :  { %v2311_v59 = vld [vmem:[#allocation2 + $0x8] sm:$0xff] }
0x1754   :  { %v2310_v60 = vld [vmem:[#allocation2] sm:$0xff] }
0x1755   :  { %v2974_v61 = vpack.c.bf16 %v2311_v59, %v2310_v60 }
0x1757   :  { %2976 = vmatprep.subr.msk.bf16.mxu0 %vm3447_vm8, %v2974_v61 }
0x1758   :  { %2979 = vmatpush3.bf16.xpose.msk.msra.mxu0 %vm3447_vm8, %v2974_v61 }
0x175c   :  { %v1108_v63 = vpop.permute.xlu1 %1107 }
0x175d   :  { %v1210_v3 = vadd.f32 %v3482_v17, %v1108_v63  ;;  %v1103_v0 = vpop.permute.xlu0 %1102 }
0x175e   :  { %v1205_v1 = vadd.f32 %v3484_v11, %v1103_v0 }
0x175f   :  { %2835 = vmatmul.mubr.msk.f32.vlgmr.msra.gmra.mrb[22].mxu0 %vm138_vm1, %v3459_v7  ;;  %v1226_v2 = vsel %vm347_vm4, %v1210_v3, 0.0 }
0x1760   :  { %1227 = vadd.xlane.f32.xlu0 %v1226_v2  ;;  %v1113_v9 = vpop.permute.xlu1 %1112  ;;  %v1223_v18 = vsel %vm347_vm4, %v1205_v1, 0.0  ;;  %2837 = vmatprep.mubr.msk.f32.mxu0 %vm138_vm1, %v3464_v8 }
0x1761   :  { %v1215_v6 = vadd.f32 %v3488_v14, %v1113_v9  ;;  %1224 = vadd.xlane.f32.xlu1 %v1223_v18  ;;  %v1118_v4 = vpop.permute.xlu0 %1117 }
0x1762   :  { %v1220_v17 = vadd.f32 %v3486_v13, %v1118_v4 }
0x1763   :  { %2838 = vmatmul.mubr.msk.f32.gmra.mrb[24].mxu0 %vm138_vm1, %v3474_v10  ;;  %v1229_v7 = vsel %vm347_vm4, %v1215_v6, 0.0 }
0x1764   :  { %1230 = vadd.xlane.f32.xlu0 %v1229_v7  ;;  %v1232_v11 = vsel %vm347_vm4, %v1220_v17, 0.0 }
0x1765   :  { %1233 = vadd.xlane.f32.xlu1 %v1232_v11 }
0x17ed   :  { %v1228_v12 = vpop.xlane.xlu0 %1227 }
0x17ee   :  { %v1225_v15 = vpop.xlane.xlu1 %1224  ;;  %v1236_v58 = vmul.f32 0.0625, %v1228_v12 }
0x17ef   :  { %v1235_v16 = vmul.f32 0.0625, %v1225_v15 }
0x17f0   :  { %v3630_v13 = vsub.f32 %v1210_v3, %v1236_v58 }
0x17f1   :  { %v1231_v14 = vpop.xlane.xlu0 %1230  ;;  %v3633_v25 = vsub.f32 %v1205_v1, %v1235_v16 }
0x17f2   :  { %v1234_v8 = vpop.xlane.xlu1 %1233  ;;  %v1237_v26 = vmul.f32 0.0625, %v1231_v14  ;;  %v1244_v33 = vmul.f32 %v3630_v13, %v3630_v13 }
0x17f3   :  { %v1238_v53 = vmul.f32 0.0625, %v1234_v8  ;;  %v1243_v36 = vmul.f32 %v3633_v25, %v3633_v25 }
0x17f4   :  { %v3641_v34 = vsub.f32 %v1215_v6, %v1237_v26  ;;  %v1250_v37 = vsel %vm347_vm4, %v1244_v33, 0.0 }
0x17f5   :  { %v3636_v31 = vsub.f32 %v1220_v17, %v1238_v53  ;;  %v1247_v41 = vsel %vm347_vm4, %v1243_v36, 0.0 }
0x17f6   :  { %v1245_v42 = vmul.f32 %v3641_v34, %v3641_v34 }
0x17f7   :  { %v1246_v38 = vmul.f32 %v3636_v31, %v3636_v31 }
0x17f8   :  { %v1253_v40 = vsel %vm347_vm4, %v1245_v42, 0.0 }
0x17f9   :  { %v1256_v43 = vsel %vm347_vm4, %v1246_v38, 0.0 }
0x1832   :  { %v2836_v21 = vpop.f32.mrb[22].mxu0 }
0x1833   :  { %v2390_v22 = vadd.f32 %v2836_v21, %v1108_v63  ;;  %v2384_v23 = vpop.f32.mrb[23].mxu0 }
0x1834   :  { %v2385_v24 = vadd.f32 %v2384_v23, %v1103_v0 }
0x1835   :  { %v2406_v10 = vsel %vm347_vm4, %v2390_v22, 0.0 }
0x1836   :  { %v2839_v27 = vpop.f32.mrb[24].mxu0  ;;  %2407 = vadd.xlane.f32.xlu1 %v2406_v10  ;;  %v2403_v28 = vsel %vm347_vm4, %v2385_v24, 0.0 }
0x1837   :  { %v2400_v29 = vadd.f32 %v2839_v27, %v1118_v4  ;;  %v2394_v30 = vpop.f32.mrb[25].mxu0  ;;  %2404 = vadd.xlane.f32.xlu0 %v2403_v28 }
0x1838   :  { %v2395_v62 = vadd.f32 %v2394_v30, %v1113_v9 }
0x1839   :  { %v2412_v32 = vsel %vm347_vm4, %v2400_v29, 0.0 }
0x183a   :  { %2413 = vadd.xlane.f32.xlu1 %v2412_v32  ;;  %v2409_v35 = vsel %vm347_vm4, %v2395_v62, 0.0 }
0x183b   :  { %2410 = vadd.xlane.f32.xlu0 %v2409_v35 }
0x183e   :  { %1251 = vadd.xlane.f32.xlu1 %v1250_v37 }
0x183f   :  { %1248 = vadd.xlane.f32.xlu0 %v1247_v41 }
0x1842   :  { %1257 = vadd.xlane.f32.xlu1 %v1256_v43 }
0x1843   :  { %1254 = vadd.xlane.f32.xlu0 %v1253_v40 }
0x18c3   :  { %v2408_v44 = vpop.xlane.xlu1 %2407 }
0x18c4   :  { %v2416_v45 = vmul.f32 0.0625, %v2408_v44  ;;  %v2405_v39 = vpop.xlane.xlu0 %2404 }
0x18c5   :  { %v2415_v19 = vmul.f32 0.0625, %v2405_v39 }
0x18c6   :  { %v3654_v46 = vsub.f32 %v2390_v22, %v2416_v45 }
0x18c7   :  { %v3656_v47 = vsub.f32 %v2385_v24, %v2415_v19  ;;  %v2414_v48 = vpop.xlane.xlu1 %2413 }
0x18c8   :  { %v2418_v20 = vmul.f32 0.0625, %v2414_v48  ;;  %v2411_v57 = vpop.xlane.xlu0 %2410  ;;  %v2424_v49 = vmul.f32 %v3654_v46, %v3654_v46 }
0x18c9   :  { %v2417_v55 = vmul.f32 0.0625, %v2411_v57  ;;  %v2423_v50 = vmul.f32 %v3656_v47, %v3656_v47 }
0x18ca   :  { %v3662_v51 = vsub.f32 %v2400_v29, %v2418_v20  ;;  %v2430_v5 = vsel %vm347_vm4, %v2424_v49, 0.0 }
0x18cb   :  { %v3665_v52 = vsub.f32 %v2395_v62, %v2417_v55  ;;  %2431 = vadd.xlane.f32.xlu1 %v2430_v5  ;;  %v1252_v54 = vpop.xlane.xlu1 %1251  ;;  %v2427_v56 = vsel %vm347_vm4, %v2423_v50, 0.0 }
0x18cc   :  { %v1260_v59 = vmul.f32 0.0625, %v1252_v54  ;;  %2428 = vadd.xlane.f32.xlu0 %v2427_v56  ;;  %v1249_v60 = vpop.xlane.xlu0 %1248  ;;  %v2426_v61 = vmul.f32 %v3662_v51, %v3662_v51 }
0x18cd   :  { %v1259_v63 = vmul.f32 0.0625, %v1249_v60  ;;  %v2425_v3 = vmul.f32 %v3665_v52, %v3665_v52 }
0x18ce   :  { %v1264_v0 = vadd.f32 1e-05, %v1260_v59  ;;  %v2436_v1 = vsel %vm347_vm4, %v2426_v61, 0.0 }
0x18cf   :  { %v1263_v2 = vadd.f32 1e-05, %v1259_v63  ;;  %2437 = vadd.xlane.f32.xlu1 %v2436_v1  ;;  %v1258_v9 = vpop.xlane.xlu1 %1257  ;;  %v2433_v18 = vsel %vm347_vm4, %v2425_v3, 0.0 }
0x18d0   :  { %3145 = vrsqrt.f32 %v1264_v0  ;;  %v1262_v6 = vmul.f32 0.0625, %v1258_v9  ;;  %2434 = vadd.xlane.f32.xlu0 %v2433_v18  ;;  %v1255_v4 = vpop.xlane.xlu0 %1254 }
0x18d1   :  { %3147 = vrsqrt.f32 %v1263_v2  ;;  %v1261_v17 = vmul.f32 0.0625, %v1255_v4 }
0x18d2   :  { %v1266_v7 = vadd.f32 1e-05, %v1262_v6 }
0x18d3   :  { %v1265_v11 = vadd.f32 1e-05, %v1261_v17 }
0x18d4   :  { %3149 = vrsqrt.f32 %v1266_v7 }
0x18d5   :  { %3151 = vrsqrt.f32 %v1265_v11 }
0x18da   :  { %v3146_v15 = vpop.eup %3145 }
0x18db   :  { %v3148_v12 = vpop.eup %3147  ;;  %v1272_v58 = vmul.f32 %v3146_v15, %v3630_v13 }
0x18dc   :  { %v1271_v16 = vmul.f32 %v3148_v12, %v3633_v25 }
0x18dd   :  { %1276 = vst.msk [vmem:[%s3721_s7 + $0x8] sm:$0xff] %vm347_vm4, %v1272_v58 }
0x18de   :  { %v3150_v8 = vpop.eup %3149  ;;  %1275 = vst.msk [vmem:[%s3721_s7] sm:$0xff] %vm347_vm4, %v1271_v16 }
0x18df   :  { %v3152_v21 = vpop.eup %3151  ;;  %v1274_v14 = vmul.f32 %v3150_v8, %v3636_v31 }
0x18e0   :  { %v1273_v22 = vmul.f32 %v3152_v21, %v3641_v34 }
0x18e1   :  { %1278 = vst.msk [vmem:[%s3721_s7 + $0x18] sm:$0xff] %vm347_vm4, %v1274_v14 }
0x18e2   :  { %1277 = vst.msk [vmem:[%s3721_s7 + $0x10] sm:$0xff] %vm347_vm4, %v1273_v22 }
0x1958   :  { %v2432_v23 = vpop.xlane.xlu1 %2431 }
0x1959   :  { %v2440_v24 = vmul.f32 0.0625, %v2432_v23  ;;  %v2429_v13 = vpop.xlane.xlu0 %2428 }
0x195a   :  { %v2439_v53 = vmul.f32 0.0625, %v2429_v13 }
0x195b   :  { %v2444_v10 = vadd.f32 1e-05, %v2440_v24 }
0x195c   :  { %v2443_v25 = vadd.f32 1e-05, %v2439_v53  ;;  %v2438_v26 = vpop.xlane.xlu1 %2437 }
0x195d   :  { %3153 = vrsqrt.f32 %v2444_v10  ;;  %v2442_v27 = vmul.f32 0.0625, %v2438_v26  ;;  %v2435_v28 = vpop.xlane.xlu0 %2434 }
0x195e   :  { %3155 = vrsqrt.f32 %v2443_v25  ;;  %v2441_v29 = vmul.f32 0.0625, %v2435_v28 }
0x195f   :  { %v2446_v30 = vadd.f32 1e-05, %v2442_v27 }
0x1960   :  { %v2445_v62 = vadd.f32 1e-05, %v2441_v29 }
0x1961   :  { %3157 = vrsqrt.f32 %v2446_v30 }
0x1962   :  { %3159 = vrsqrt.f32 %v2445_v62 }
0x1967   :  { %v3154_v31 = vpop.eup %3153 }
0x1968   :  { %v3156_v32 = vpop.eup %3155  ;;  %v2452_v33 = vmul.f32 %v3154_v31, %v3654_v46 }
0x1969   :  { %v2451_v34 = vmul.f32 %v3156_v32, %v3656_v47 }
0x196a   :  { %2537 = vst.msk [vmem:[%s3721_s7 + $0x28] sm:$0xff] %vm347_vm4, %v2452_v33 }
0x196b   :  { %v3158_v35 = vpop.eup %3157  ;;  %2536 = vst.msk [vmem:[%s3721_s7 + $0x20] sm:$0xff] %vm347_vm4, %v2451_v34 }
0x196c   :  { %v3160_v36 = vpop.eup %3159  ;;  %v2454_v37 = vmul.f32 %v3158_v35, %v3662_v51 }
0x196d   :  { %v2453_v38 = vmul.f32 %v3160_v36, %v3665_v52 }
0x196e   :  { %2539 = vst.msk [vmem:[%s3721_s7 + $0x38] sm:$0xff] %vm347_vm4, %v2454_v37 }
0x196f   :  { %2538 = vst.msk [vmem:[%s3721_s7 + $0x30] sm:$0xff] %vm347_vm4, %v2453_v38 }

</bundles_post_ra>
